<compile_context>
chip_gen: v7x
topology: tpu7x:2x2x1
jax: 0.10.0
libtpu: 0.0.40
codegen_flags: <defaults>
</compile_context>

<pallas_src>
import functools

import jax
import jax.numpy as jnp
from jax.experimental import pallas as pl
from jax.experimental.pallas import tpu as pltpu


# ----------------------------- Pallas kernel --------------------------------

def encoder_stack_kernel(
    tok_ref,    # (NS, 1)   int32 token ids
    wemb_ref,   # (Vp, E)   word embedding table, rows zero-padded to Vp
    pos_ref,    # (S, E)    positional embeddings for positions [0, S)
    wqkv_ref,   # (L, E, 3E) [Wq_bd^T*scale | Wk_bd^T | Wv_bd^T]
    wfc_ref,    # (L, E, E)  Wfc^T
    w1_ref,     # (L, E, FE) W1^T
    w2_ref,     # (L, FE, E) W2^T
    vec_ref,    # (L, 7, VW) rows: bfc, g1, bt1, b2, g2, bt2 (pad to VW), b1
    o_ref,      # (NS, E)
    *, N, S, E, H, D, FE, L,
):
    NS = N * S
    Vp = wemb_ref.shape[0]

    # ---- fused embedding: one-hot gather on the MXU + positional add ----
    tok = tok_ref[...]                                         # (NS, 1) int32
    cols = jax.lax.broadcasted_iota(jnp.int32, (NS, Vp), 1)
    onehot = (cols == tok).astype(jnp.float32)                 # (NS, Vp)
    x = jnp.dot(onehot, wemb_ref[...], preferred_element_type=jnp.float32)
    x = (x.reshape(N, S, E) + pos_ref[...][None, :, :]).reshape(NS, E)
    # dropout(p=0.5) -> identity in eval mode

    for l in range(L):                       # L is small: fully unrolled
        wqkv = wqkv_ref[l]                   # (E, 3E)
        wfcT = wfc_ref[l]                    # (E, E)
        w1T = w1_ref[l]                      # (E, FE)
        w2T = w2_ref[l]                      # (FE, E)
        vecs = vec_ref[l]                    # (7, VW)
        bfc = vecs[0:1, :E]
        g1 = vecs[1:2, :E]
        bt1 = vecs[2:3, :E]
        b2 = vecs[3:4, :E]
        g2 = vecs[4:5, :E]
        bt2 = vecs[5:6, :E]
        b1 = vecs[6:7, :FE]

        # ---- multi-head self-attention (query = key = value = x) ----
        qkv = jnp.dot(x, wqkv, preferred_element_type=jnp.float32)  # (NS, 3E)
        q3 = qkv[:, 0:E].reshape(N, S, E)        # 1/sqrt(E) folded into Wq
        k3 = qkv[:, E:2 * E].reshape(N, S, E)
        v3 = qkv[:, 2 * E:3 * E].reshape(N, S, E)

        head_outs = []
        for h in range(H):
            lo = h * D
            qh = q3[:, :, lo:lo + D]
            kh = k3[:, :, lo:lo + D]
            vh = v3[:, :, lo:lo + D]
            en = jnp.einsum("nqd,nkd->nqk", qh, kh,
                            preferred_element_type=jnp.float32)     # (N,S,S)
            en = en - jnp.max(en, axis=-1, keepdims=True)
            p = jnp.exp(en)
            attn = p / jnp.sum(p, axis=-1, keepdims=True)
            oh = jnp.einsum("nqk,nkd->nqd", attn, vh,
                            preferred_element_type=jnp.float32)     # (N,S,D)
            head_outs.append(oh.reshape(NS, D))
        concat = jnp.concatenate(head_outs, axis=-1)                 # (NS, E)
        attn_out = jnp.dot(concat, wfcT,
                           preferred_element_type=jnp.float32) + bfc

        # ---- residual + LayerNorm 1 ----
        h1 = attn_out + x
        mu1 = jnp.mean(h1, axis=-1, keepdims=True)
        var1 = jnp.mean((h1 - mu1) ** 2, axis=-1, keepdims=True)
        x1 = (h1 - mu1) * jax.lax.rsqrt(var1 + 1e-5) * g1 + bt1

        # ---- feed-forward ----
        ff = jnp.maximum(
            jnp.dot(x1, w1T, preferred_element_type=jnp.float32) + b1, 0.0)
        ff = jnp.dot(ff, w2T, preferred_element_type=jnp.float32) + b2

        # ---- residual + LayerNorm 2 ----
        h2 = ff + x1
        mu2 = jnp.mean(h2, axis=-1, keepdims=True)
        var2 = jnp.mean((h2 - mu2) ** 2, axis=-1, keepdims=True)
        x = (h2 - mu2) * jax.lax.rsqrt(var2 + 1e-5) * g2 + bt2

    o_ref[...] = x.astype(o_ref.dtype)


# ------------------------------ wrappers -------------------------------------

def _pack_layer_params(layers, heads, embed):
    """Stack / pre-transpose / block-diagonalize per-layer weights (trace time)."""
    E = embed
    FE = layers[0]["w1"].shape[0]
    VW = max(E, FE)
    scale = float(E) ** -0.5
    eye_h = jnp.eye(heads, dtype=jnp.float32)

    def pad_row(v):                      # (1, w) -> (1, VW), zero padded
        return jnp.pad(v, ((0, 0), (0, VW - v.shape[1])))

    wqkv, wfc, w1, w2, vec = [], [], [], [], []
    for lp in layers:
        wq_bd = jnp.kron(eye_h, lp["wq"].T) * scale   # (E, E), scale folded in
        wk_bd = jnp.kron(eye_h, lp["wk"].T)
        wv_bd = jnp.kron(eye_h, lp["wv"].T)
        wqkv.append(jnp.concatenate([wq_bd, wk_bd, wv_bd], axis=1))  # (E, 3E)
        wfc.append(lp["wfc"].T)                                      # (E, E)
        w1.append(lp["w1"].T)                                        # (E, FE)
        w2.append(lp["w2"].T)                                        # (FE, E)
        vec.append(jnp.concatenate(
            [pad_row(lp["bfc"]), pad_row(lp["g1"]), pad_row(lp["bt1"]),
             pad_row(lp["b2"]), pad_row(lp["g2"]), pad_row(lp["bt2"]),
             pad_row(lp["b1"])], axis=0))                            # (7, VW)
    return (jnp.stack(wqkv), jnp.stack(wfc), jnp.stack(w1), jnp.stack(w2),
            jnp.stack(vec))


@functools.partial(jax.jit, static_argnums=(2,))
def encoder_forward(tokens, params, heads):
    N, S = tokens.shape
    V, E = params["word_emb"].shape
    D = E // heads
    L = len(params["layers"])
    FE = params["layers"][0]["w1"].shape[0]
    Vp = ((V + 127) // 128) * 128          # pad vocab rows -> clean MXU shapes

    wemb = jnp.pad(params["word_emb"].astype(jnp.float32),
                   ((0, Vp - V), (0, 0)))
    pos = params["pos_emb"][:S].astype(jnp.float32)
    tok2 = tokens.reshape(N * S, 1).astype(jnp.int32)

    wqkv, wfc, w1, w2, vec = _pack_layer_params(params["layers"], heads, E)

    kernel = functools.partial(
        encoder_stack_kernel, N=N, S=S, E=E, H=heads, D=D, FE=FE, L=L)

    vmem = pl.BlockSpec(memory_space=pltpu.MemorySpace.VMEM)
    out = pl.pallas_call(
        kernel,
        out_shape=jax.ShapeDtypeStruct((N * S, E), jnp.float32),
        in_specs=[vmem] * 8,
        out_specs=vmem,
    )(tok2, wemb, pos, wqkv, wfc, w1, w2, vec)
    return out.reshape(N, S, E)


# --------------------------- deterministic init -------------------------------

def init_params(key, vocab, embed, heads, n_layers, max_len, fwd_exp):
    head_dim = embed // heads
    ks = jax.random.split(key, 2 + n_layers)
    params = {
        "word_emb": 0.02 * jax.random.normal(ks[0], (vocab, embed), jnp.float32),
        "pos_emb": 0.02 * jax.random.normal(ks[1], (max_len, embed), jnp.float32),
        "layers": [],
    }
    for li in range(n_layers):
        lk = jax.random.split(ks[2 + li], 8)
        lp = {
            "wq": 0.1 * jax.random.normal(lk[0], (head_dim, head_dim), jnp.float32),
            "wk": 0.1 * jax.random.normal(lk[1], (head_dim, head_dim), jnp.float32),
            "wv": 0.1 * jax.random.normal(lk[2], (head_dim, head_dim), jnp.float32),
            "wfc": 0.1 * jax.random.normal(lk[3], (embed, embed), jnp.float32),
            "bfc": 0.01 * jax.random.normal(lk[4], (1, embed), jnp.float32),
            "g1": jnp.ones((1, embed), jnp.float32),
            "bt1": jnp.zeros((1, embed), jnp.float32),
            "w1": 0.1 * jax.random.normal(lk[5], (fwd_exp * embed, embed), jnp.float32),
            "b1": 0.01 * jax.random.normal(lk[6], (1, fwd_exp * embed), jnp.float32),
            "w2": 0.1 * jax.random.normal(lk[7], (embed, fwd_exp * embed), jnp.float32),
            "b2": jnp.zeros((1, embed), jnp.float32),
            "g2": jnp.ones((1, embed), jnp.float32),
            "bt2": jnp.zeros((1, embed), jnp.float32),
        }
        params["layers"].append(lp)
    return params


# ---------------------------------- main --------------------------------------

if __name__ == "__main__":
    SRC_VOCAB = 50
    EMBED = 32
    HEADS = 4
    N_LAYERS = 2
    MAX_LEN = 16
    FWD_EXP = 2
    BATCH = 2
    SEQ = 8

    key = jax.random.PRNGKey(0)
    k_tok, k_par = jax.random.split(key)
    tokens = jax.random.randint(k_tok, (BATCH, SEQ), 0, SRC_VOCAB, dtype=jnp.int32)
    params = init_params(k_par, SRC_VOCAB, EMBED, HEADS, N_LAYERS, MAX_LEN, FWD_EXP)

    out = encoder_forward(tokens, params, HEADS)
    jax.block_until_ready(out)
    assert out.shape == (BATCH, SEQ, EMBED)
    assert bool(jnp.all(jnp.isfinite(out)))
    print("KERNEL_OK")
</pallas_src>

<mosaic_0001>
module attributes {stable_mosaic.version = 11 : i64} {
  func.func @encoder_stack_kernel(%arg0: memref<16x1xi32, #tpu.memory_space<vmem>>, %arg1: memref<128x32xf32, #tpu.memory_space<vmem>>, %arg2: memref<8x32xf32, #tpu.memory_space<vmem>>, %arg3: memref<2x32x96xf32, #tpu.memory_space<vmem>>, %arg4: memref<2x32x32xf32, #tpu.memory_space<vmem>>, %arg5: memref<2x32x64xf32, #tpu.memory_space<vmem>>, %arg6: memref<2x64x32xf32, #tpu.memory_space<vmem>>, %arg7: memref<2x7x64xf32, #tpu.memory_space<vmem>>, %arg8: memref<16x32xf32, #tpu.memory_space<vmem>>) attributes {dimension_semantics = [], scalar_prefetch = 0 : i64, scratch_operands = 0 : i64, tpu.core_type = #tpu.core_type<tc>} {
    %c0 = arith.constant 0 : index
    %c0_0 = arith.constant 0 : index
    %0 = vector.load %arg0[%c0, %c0_0] : memref<16x1xi32, #tpu.memory_space<vmem>>, vector<16x1xi32>
    %1 = tpu.iota {dimensions = array<i32: 1>} : vector<16x128xi32>
    %2 = vector.broadcast %0 : vector<16x1xi32> to vector<16x128xi32>
    %3 = arith.cmpi eq, %1, %2 : vector<16x128xi32>
    %4 = arith.extui %3 : vector<16x128xi1> to vector<16x128xi32>
    %5 = arith.sitofp %4 : vector<16x128xi32> to vector<16x128xf32>
    %c0_1 = arith.constant 0 : index
    %c0_2 = arith.constant 0 : index
    %6 = vector.load %arg1[%c0_1, %c0_2] : memref<128x32xf32, #tpu.memory_space<vmem>>, vector<128x32xf32>
    %cst = arith.constant dense<0.000000e+00> : vector<16x32xf32>
    %7 = tpu.matmul %5, %6, %cst {dimension_numbers = #tpu.dot_dimension_numbers<[1], [0], [0], [1], [0, 0, 1, 1], [], []>} : vector<16x128xf32>, vector<128x32xf32>, vector<16x32xf32> -> vector<16x32xf32>
    %8 = vector.shape_cast %7 : vector<16x32xf32> to vector<2x8x32xf32>
    %c0_3 = arith.constant 0 : index
    %c0_4 = arith.constant 0 : index
    %9 = vector.load %arg2[%c0_3, %c0_4] : memref<8x32xf32, #tpu.memory_space<vmem>>, vector<8x32xf32>
    %10 = vector.shape_cast %9 : vector<8x32xf32> to vector<1x8x32xf32>
    %11 = vector.broadcast %10 : vector<1x8x32xf32> to vector<2x8x32xf32>
    %12 = arith.addf %8, %11 : vector<2x8x32xf32>
    %13 = vector.shape_cast %12 : vector<2x8x32xf32> to vector<16x32xf32>
    %c0_5 = arith.constant 0 : index
    %c0_6 = arith.constant 0 : index
    %c0_7 = arith.constant 0 : index
    %14 = vector.load %arg3[%c0_5, %c0_6, %c0_7] : memref<2x32x96xf32, #tpu.memory_space<vmem>>, vector<1x32x96xf32>
    %15 = vector.shape_cast %14 : vector<1x32x96xf32> to vector<32x96xf32>
    %c0_8 = arith.constant 0 : index
    %c0_9 = arith.constant 0 : index
    %c0_10 = arith.constant 0 : index
    %16 = vector.load %arg4[%c0_8, %c0_9, %c0_10] : memref<2x32x32xf32, #tpu.memory_space<vmem>>, vector<1x32x32xf32>
    %17 = vector.shape_cast %16 : vector<1x32x32xf32> to vector<32x32xf32>
    %c0_11 = arith.constant 0 : index
    %c0_12 = arith.constant 0 : index
    %c0_13 = arith.constant 0 : index
    %18 = vector.load %arg5[%c0_11, %c0_12, %c0_13] : memref<2x32x64xf32, #tpu.memory_space<vmem>>, vector<1x32x64xf32>
    %19 = vector.shape_cast %18 : vector<1x32x64xf32> to vector<32x64xf32>
    %c0_14 = arith.constant 0 : index
    %c0_15 = arith.constant 0 : index
    %c0_16 = arith.constant 0 : index
    %20 = vector.load %arg6[%c0_14, %c0_15, %c0_16] : memref<2x64x32xf32, #tpu.memory_space<vmem>>, vector<1x64x32xf32>
    %21 = vector.shape_cast %20 : vector<1x64x32xf32> to vector<64x32xf32>
    %c0_17 = arith.constant 0 : index
    %c0_18 = arith.constant 0 : index
    %c0_19 = arith.constant 0 : index
    %22 = vector.load %arg7[%c0_17, %c0_18, %c0_19] : memref<2x7x64xf32, #tpu.memory_space<vmem>>, vector<1x7x64xf32>
    %23 = vector.shape_cast %22 : vector<1x7x64xf32> to vector<7x64xf32>
    %24 = vector.extract_strided_slice %23 {offsets = [0, 0], sizes = [1, 32], strides = [1, 1]} : vector<7x64xf32> to vector<1x32xf32>
    %25 = vector.extract_strided_slice %23 {offsets = [1, 0], sizes = [1, 32], strides = [1, 1]} : vector<7x64xf32> to vector<1x32xf32>
    %26 = vector.extract_strided_slice %23 {offsets = [2, 0], sizes = [1, 32], strides = [1, 1]} : vector<7x64xf32> to vector<1x32xf32>
    %27 = vector.extract_strided_slice %23 {offsets = [3, 0], sizes = [1, 32], strides = [1, 1]} : vector<7x64xf32> to vector<1x32xf32>
    %28 = vector.extract_strided_slice %23 {offsets = [4, 0], sizes = [1, 32], strides = [1, 1]} : vector<7x64xf32> to vector<1x32xf32>
    %29 = vector.extract_strided_slice %23 {offsets = [5, 0], sizes = [1, 32], strides = [1, 1]} : vector<7x64xf32> to vector<1x32xf32>
    %30 = vector.extract_strided_slice %23 {offsets = [6, 0], sizes = [1, 64], strides = [1, 1]} : vector<7x64xf32> to vector<1x64xf32>
    %cst_20 = arith.constant dense<0.000000e+00> : vector<16x96xf32>
    %31 = tpu.matmul %13, %15, %cst_20 {dimension_numbers = #tpu.dot_dimension_numbers<[1], [0], [0], [1], [0, 0, 1, 1], [], []>} : vector<16x32xf32>, vector<32x96xf32>, vector<16x96xf32> -> vector<16x96xf32>
    %32 = vector.extract_strided_slice %31 {offsets = [0, 0], sizes = [16, 32], strides = [1, 1]} : vector<16x96xf32> to vector<16x32xf32>
    %33 = vector.shape_cast %32 : vector<16x32xf32> to vector<2x8x32xf32>
    %34 = vector.extract_strided_slice %31 {offsets = [0, 32], sizes = [16, 32], strides = [1, 1]} : vector<16x96xf32> to vector<16x32xf32>
    %35 = vector.shape_cast %34 : vector<16x32xf32> to vector<2x8x32xf32>
    %36 = vector.extract_strided_slice %31 {offsets = [0, 64], sizes = [16, 32], strides = [1, 1]} : vector<16x96xf32> to vector<16x32xf32>
    %37 = vector.shape_cast %36 : vector<16x32xf32> to vector<2x8x32xf32>
    %38 = vector.extract_strided_slice %33 {offsets = [0, 0, 0], sizes = [2, 8, 8], strides = [1, 1, 1]} : vector<2x8x32xf32> to vector<2x8x8xf32>
    %39 = vector.extract_strided_slice %35 {offsets = [0, 0, 0], sizes = [2, 8, 8], strides = [1, 1, 1]} : vector<2x8x32xf32> to vector<2x8x8xf32>
    %40 = vector.extract_strided_slice %37 {offsets = [0, 0, 0], sizes = [2, 8, 8], strides = [1, 1, 1]} : vector<2x8x32xf32> to vector<2x8x8xf32>
    "tpu.trace_start"() <{level = 10 : i32, message = "nqd,nkd->nqk"}> : () -> ()
    %cst_21 = arith.constant dense<0.000000e+00> : vector<2x8x8xf32>
    %41 = tpu.matmul %38, %39, %cst_21 {dimension_numbers = #tpu.dot_dimension_numbers<[2], [2], [1], [1], [0, 0, 0, 1, 1, 1], [0], [0]>} : vector<2x8x8xf32>, vector<2x8x8xf32>, vector<2x8x8xf32> -> vector<2x8x8xf32>
    "tpu.trace_stop"() : () -> ()
    %cst_22 = arith.constant dense<0xFF800000> : vector<2x8xf32>
    %42 = vector.multi_reduction <maximumf>, %41, %cst_22 [2] : vector<2x8x8xf32> to vector<2x8xf32>
    %43 = vector.shape_cast %42 : vector<2x8xf32> to vector<2x8x1xf32>
    %44 = vector.broadcast %43 : vector<2x8x1xf32> to vector<2x8x8xf32>
    %45 = arith.subf %41, %44 : vector<2x8x8xf32>
    %46 = math.exp %45 : vector<2x8x8xf32>
    %cst_23 = arith.constant dense<0.000000e+00> : vector<2x8xf32>
    %47 = vector.multi_reduction <add>, %46, %cst_23 [2] : vector<2x8x8xf32> to vector<2x8xf32>
    %48 = vector.shape_cast %47 : vector<2x8xf32> to vector<2x8x1xf32>
    %49 = vector.broadcast %48 : vector<2x8x1xf32> to vector<2x8x8xf32>
    %50 = arith.divf %46, %49 : vector<2x8x8xf32>
    "tpu.trace_start"() <{level = 10 : i32, message = "nqk,nkd->nqd"}> : () -> ()
    %cst_24 = arith.constant dense<0.000000e+00> : vector<2x8x8xf32>
    %51 = tpu.matmul %50, %40, %cst_24 {dimension_numbers = #tpu.dot_dimension_numbers<[2], [1], [1], [2], [0, 0, 0, 1, 1, 2], [0], [0]>} : vector<2x8x8xf32>, vector<2x8x8xf32>, vector<2x8x8xf32> -> vector<2x8x8xf32>
    "tpu.trace_stop"() : () -> ()
    %52 = vector.shape_cast %51 : vector<2x8x8xf32> to vector<16x8xf32>
    %53 = vector.extract_strided_slice %33 {offsets = [0, 0, 8], sizes = [2, 8, 8], strides = [1, 1, 1]} : vector<2x8x32xf32> to vector<2x8x8xf32>
    %54 = vector.extract_strided_slice %35 {offsets = [0, 0, 8], sizes = [2, 8, 8], strides = [1, 1, 1]} : vector<2x8x32xf32> to vector<2x8x8xf32>
    %55 = vector.extract_strided_slice %37 {offsets = [0, 0, 8], sizes = [2, 8, 8], strides = [1, 1, 1]} : vector<2x8x32xf32> to vector<2x8x8xf32>
    "tpu.trace_start"() <{level = 10 : i32, message = "nqd,nkd->nqk"}> : () -> ()
    %cst_25 = arith.constant dense<0.000000e+00> : vector<2x8x8xf32>
    %56 = tpu.matmul %53, %54, %cst_25 {dimension_numbers = #tpu.dot_dimension_numbers<[2], [2], [1], [1], [0, 0, 0, 1, 1, 1], [0], [0]>} : vector<2x8x8xf32>, vector<2x8x8xf32>, vector<2x8x8xf32> -> vector<2x8x8xf32>
    "tpu.trace_stop"() : () -> ()
    %cst_26 = arith.constant dense<0xFF800000> : vector<2x8xf32>
    %57 = vector.multi_reduction <maximumf>, %56, %cst_26 [2] : vector<2x8x8xf32> to vector<2x8xf32>
    %58 = vector.shape_cast %57 : vector<2x8xf32> to vector<2x8x1xf32>
    %59 = vector.broadcast %58 : vector<2x8x1xf32> to vector<2x8x8xf32>
    %60 = arith.subf %56, %59 : vector<2x8x8xf32>
    %61 = math.exp %60 : vector<2x8x8xf32>
    %cst_27 = arith.constant dense<0.000000e+00> : vector<2x8xf32>
    %62 = vector.multi_reduction <add>, %61, %cst_27 [2] : vector<2x8x8xf32> to vector<2x8xf32>
    %63 = vector.shape_cast %62 : vector<2x8xf32> to vector<2x8x1xf32>
    %64 = vector.broadcast %63 : vector<2x8x1xf32> to vector<2x8x8xf32>
    %65 = arith.divf %61, %64 : vector<2x8x8xf32>
    "tpu.trace_start"() <{level = 10 : i32, message = "nqk,nkd->nqd"}> : () -> ()
    %cst_28 = arith.constant dense<0.000000e+00> : vector<2x8x8xf32>
    %66 = tpu.matmul %65, %55, %cst_28 {dimension_numbers = #tpu.dot_dimension_numbers<[2], [1], [1], [2], [0, 0, 0, 1, 1, 2], [0], [0]>} : vector<2x8x8xf32>, vector<2x8x8xf32>, vector<2x8x8xf32> -> vector<2x8x8xf32>
    "tpu.trace_stop"() : () -> ()
    %67 = vector.shape_cast %66 : vector<2x8x8xf32> to vector<16x8xf32>
    %68 = vector.extract_strided_slice %33 {offsets = [0, 0, 16], sizes = [2, 8, 8], strides = [1, 1, 1]} : vector<2x8x32xf32> to vector<2x8x8xf32>
    %69 = vector.extract_strided_slice %35 {offsets = [0, 0, 16], sizes = [2, 8, 8], strides = [1, 1, 1]} : vector<2x8x32xf32> to vector<2x8x8xf32>
    %70 = vector.extract_strided_slice %37 {offsets = [0, 0, 16], sizes = [2, 8, 8], strides = [1, 1, 1]} : vector<2x8x32xf32> to vector<2x8x8xf32>
    "tpu.trace_start"() <{level = 10 : i32, message = "nqd,nkd->nqk"}> : () -> ()
    %cst_29 = arith.constant dense<0.000000e+00> : vector<2x8x8xf32>
    %71 = tpu.matmul %68, %69, %cst_29 {dimension_numbers = #tpu.dot_dimension_numbers<[2], [2], [1], [1], [0, 0, 0, 1, 1, 1], [0], [0]>} : vector<2x8x8xf32>, vector<2x8x8xf32>, vector<2x8x8xf32> -> vector<2x8x8xf32>
    "tpu.trace_stop"() : () -> ()
    %cst_30 = arith.constant dense<0xFF800000> : vector<2x8xf32>
    %72 = vector.multi_reduction <maximumf>, %71, %cst_30 [2] : vector<2x8x8xf32> to vector<2x8xf32>
    %73 = vector.shape_cast %72 : vector<2x8xf32> to vector<2x8x1xf32>
    %74 = vector.broadcast %73 : vector<2x8x1xf32> to vector<2x8x8xf32>
    %75 = arith.subf %71, %74 : vector<2x8x8xf32>
    %76 = math.exp %75 : vector<2x8x8xf32>
    %cst_31 = arith.constant dense<0.000000e+00> : vector<2x8xf32>
    %77 = vector.multi_reduction <add>, %76, %cst_31 [2] : vector<2x8x8xf32> to vector<2x8xf32>
    %78 = vector.shape_cast %77 : vector<2x8xf32> to vector<2x8x1xf32>
    %79 = vector.broadcast %78 : vector<2x8x1xf32> to vector<2x8x8xf32>
    %80 = arith.divf %76, %79 : vector<2x8x8xf32>
    "tpu.trace_start"() <{level = 10 : i32, message = "nqk,nkd->nqd"}> : () -> ()
    %cst_32 = arith.constant dense<0.000000e+00> : vector<2x8x8xf32>
    %81 = tpu.matmul %80, %70, %cst_32 {dimension_numbers = #tpu.dot_dimension_numbers<[2], [1], [1], [2], [0, 0, 0, 1, 1, 2], [0], [0]>} : vector<2x8x8xf32>, vector<2x8x8xf32>, vector<2x8x8xf32> -> vector<2x8x8xf32>
    "tpu.trace_stop"() : () -> ()
    %82 = vector.shape_cast %81 : vector<2x8x8xf32> to vector<16x8xf32>
    %83 = vector.extract_strided_slice %33 {offsets = [0, 0, 24], sizes = [2, 8, 8], strides = [1, 1, 1]} : vector<2x8x32xf32> to vector<2x8x8xf32>
    %84 = vector.extract_strided_slice %35 {offsets = [0, 0, 24], sizes = [2, 8, 8], strides = [1, 1, 1]} : vector<2x8x32xf32> to vector<2x8x8xf32>
    %85 = vector.extract_strided_slice %37 {offsets = [0, 0, 24], sizes = [2, 8, 8], strides = [1, 1, 1]} : vector<2x8x32xf32> to vector<2x8x8xf32>
    "tpu.trace_start"() <{level = 10 : i32, message = "nqd,nkd->nqk"}> : () -> ()
    %cst_33 = arith.constant dense<0.000000e+00> : vector<2x8x8xf32>
    %86 = tpu.matmul %83, %84, %cst_33 {dimension_numbers = #tpu.dot_dimension_numbers<[2], [2], [1], [1], [0, 0, 0, 1, 1, 1], [0], [0]>} : vector<2x8x8xf32>, vector<2x8x8xf32>, vector<2x8x8xf32> -> vector<2x8x8xf32>
    "tpu.trace_stop"() : () -> ()
    %cst_34 = arith.constant dense<0xFF800000> : vector<2x8xf32>
    %87 = vector.multi_reduction <maximumf>, %86, %cst_34 [2] : vector<2x8x8xf32> to vector<2x8xf32>
    %88 = vector.shape_cast %87 : vector<2x8xf32> to vector<2x8x1xf32>
    %89 = vector.broadcast %88 : vector<2x8x1xf32> to vector<2x8x8xf32>
    %90 = arith.subf %86, %89 : vector<2x8x8xf32>
    %91 = math.exp %90 : vector<2x8x8xf32>
    %cst_35 = arith.constant dense<0.000000e+00> : vector<2x8xf32>
    %92 = vector.multi_reduction <add>, %91, %cst_35 [2] : vector<2x8x8xf32> to vector<2x8xf32>
    %93 = vector.shape_cast %92 : vector<2x8xf32> to vector<2x8x1xf32>
    %94 = vector.broadcast %93 : vector<2x8x1xf32> to vector<2x8x8xf32>
    %95 = arith.divf %91, %94 : vector<2x8x8xf32>
    "tpu.trace_start"() <{level = 10 : i32, message = "nqk,nkd->nqd"}> : () -> ()
    %cst_36 = arith.constant dense<0.000000e+00> : vector<2x8x8xf32>
    %96 = tpu.matmul %95, %85, %cst_36 {dimension_numbers = #tpu.dot_dimension_numbers<[2], [1], [1], [2], [0, 0, 0, 1, 1, 2], [0], [0]>} : vector<2x8x8xf32>, vector<2x8x8xf32>, vector<2x8x8xf32> -> vector<2x8x8xf32>
    "tpu.trace_stop"() : () -> ()
    %97 = vector.shape_cast %96 : vector<2x8x8xf32> to vector<16x8xf32>
    %98 = tpu.concatenate %52, %67, %82, %97 in 1 : vector<16x8xf32>, vector<16x8xf32>, vector<16x8xf32>, vector<16x8xf32> -> vector<16x32xf32>
    %cst_37 = arith.constant dense<0.000000e+00> : vector<16x32xf32>
    %99 = tpu.matmul %98, %17, %cst_37 {dimension_numbers = #tpu.dot_dimension_numbers<[1], [0], [0], [1], [0, 0, 1, 1], [], []>} : vector<16x32xf32>, vector<32x32xf32>, vector<16x32xf32> -> vector<16x32xf32>
    %100 = vector.broadcast %24 : vector<1x32xf32> to vector<16x32xf32>
    %101 = arith.addf %99, %100 : vector<16x32xf32>
    %102 = arith.addf %101, %13 : vector<16x32xf32>
    %cst_38 = arith.constant dense<0.000000e+00> : vector<16xf32>
    %103 = vector.multi_reduction <add>, %102, %cst_38 [1] : vector<16x32xf32> to vector<16xf32>
    %104 = vector.shape_cast %103 : vector<16xf32> to vector<16x1xf32>
    %cst_39 = arith.constant 3.200000e+01 : f32
    %105 = vector.broadcast %cst_39 : f32 to vector<16x1xf32>
    %106 = arith.divf %104, %105 : vector<16x1xf32>
    %107 = vector.broadcast %106 : vector<16x1xf32> to vector<16x32xf32>
    %108 = arith.subf %102, %107 : vector<16x32xf32>
    %109 = arith.mulf %108, %108 : vector<16x32xf32>
    %cst_40 = arith.constant dense<0.000000e+00> : vector<16xf32>
    %110 = vector.multi_reduction <add>, %109, %cst_40 [1] : vector<16x32xf32> to vector<16xf32>
    %111 = vector.shape_cast %110 : vector<16xf32> to vector<16x1xf32>
    %cst_41 = arith.constant 3.200000e+01 : f32
    %112 = vector.broadcast %cst_41 : f32 to vector<16x1xf32>
    %113 = arith.divf %111, %112 : vector<16x1xf32>
    %114 = vector.broadcast %106 : vector<16x1xf32> to vector<16x32xf32>
    %115 = arith.subf %102, %114 : vector<16x32xf32>
    %cst_42 = arith.constant 9.99999974E-6 : f32
    %116 = vector.broadcast %cst_42 : f32 to vector<16x1xf32>
    %117 = arith.addf %113, %116 : vector<16x1xf32>
    %118 = math.rsqrt %117 : vector<16x1xf32>
    %119 = vector.broadcast %118 : vector<16x1xf32> to vector<16x32xf32>
    %120 = arith.mulf %115, %119 : vector<16x32xf32>
    %121 = vector.broadcast %25 : vector<1x32xf32> to vector<16x32xf32>
    %122 = arith.mulf %120, %121 : vector<16x32xf32>
    %123 = vector.broadcast %26 : vector<1x32xf32> to vector<16x32xf32>
    %124 = arith.addf %122, %123 : vector<16x32xf32>
    %cst_43 = arith.constant dense<0.000000e+00> : vector<16x64xf32>
    %125 = tpu.matmul %124, %19, %cst_43 {dimension_numbers = #tpu.dot_dimension_numbers<[1], [0], [0], [1], [0, 0, 1, 1], [], []>} : vector<16x32xf32>, vector<32x64xf32>, vector<16x64xf32> -> vector<16x64xf32>
    %126 = vector.broadcast %30 : vector<1x64xf32> to vector<16x64xf32>
    %127 = arith.addf %125, %126 : vector<16x64xf32>
    %cst_44 = arith.constant 0.000000e+00 : f32
    %128 = vector.broadcast %cst_44 : f32 to vector<16x64xf32>
    %129 = arith.maximumf %127, %128 : vector<16x64xf32>
    %cst_45 = arith.constant dense<0.000000e+00> : vector<16x32xf32>
    %130 = tpu.matmul %129, %21, %cst_45 {dimension_numbers = #tpu.dot_dimension_numbers<[1], [0], [0], [1], [0, 0, 1, 1], [], []>} : vector<16x64xf32>, vector<64x32xf32>, vector<16x32xf32> -> vector<16x32xf32>
    %131 = vector.broadcast %27 : vector<1x32xf32> to vector<16x32xf32>
    %132 = arith.addf %130, %131 : vector<16x32xf32>
    %133 = arith.addf %132, %124 : vector<16x32xf32>
    %cst_46 = arith.constant dense<0.000000e+00> : vector<16xf32>
    %134 = vector.multi_reduction <add>, %133, %cst_46 [1] : vector<16x32xf32> to vector<16xf32>
    %135 = vector.shape_cast %134 : vector<16xf32> to vector<16x1xf32>
    %cst_47 = arith.constant 3.200000e+01 : f32
    %136 = vector.broadcast %cst_47 : f32 to vector<16x1xf32>
    %137 = arith.divf %135, %136 : vector<16x1xf32>
    %138 = vector.broadcast %137 : vector<16x1xf32> to vector<16x32xf32>
    %139 = arith.subf %133, %138 : vector<16x32xf32>
    %140 = arith.mulf %139, %139 : vector<16x32xf32>
    %cst_48 = arith.constant dense<0.000000e+00> : vector<16xf32>
    %141 = vector.multi_reduction <add>, %140, %cst_48 [1] : vector<16x32xf32> to vector<16xf32>
    %142 = vector.shape_cast %141 : vector<16xf32> to vector<16x1xf32>
    %cst_49 = arith.constant 3.200000e+01 : f32
    %143 = vector.broadcast %cst_49 : f32 to vector<16x1xf32>
    %144 = arith.divf %142, %143 : vector<16x1xf32>
    %145 = vector.broadcast %137 : vector<16x1xf32> to vector<16x32xf32>
    %146 = arith.subf %133, %145 : vector<16x32xf32>
    %cst_50 = arith.constant 9.99999974E-6 : f32
    %147 = vector.broadcast %cst_50 : f32 to vector<16x1xf32>
    %148 = arith.addf %144, %147 : vector<16x1xf32>
    %149 = math.rsqrt %148 : vector<16x1xf32>
    %150 = vector.broadcast %149 : vector<16x1xf32> to vector<16x32xf32>
    %151 = arith.mulf %146, %150 : vector<16x32xf32>
    %152 = vector.broadcast %28 : vector<1x32xf32> to vector<16x32xf32>
    %153 = arith.mulf %151, %152 : vector<16x32xf32>
    %154 = vector.broadcast %29 : vector<1x32xf32> to vector<16x32xf32>
    %155 = arith.addf %153, %154 : vector<16x32xf32>
    %c1 = arith.constant 1 : index
    %c0_51 = arith.constant 0 : index
    %c0_52 = arith.constant 0 : index
    %156 = vector.load %arg3[%c1, %c0_51, %c0_52] : memref<2x32x96xf32, #tpu.memory_space<vmem>>, vector<1x32x96xf32>
    %157 = vector.shape_cast %156 : vector<1x32x96xf32> to vector<32x96xf32>
    %c1_53 = arith.constant 1 : index
    %c0_54 = arith.constant 0 : index
    %c0_55 = arith.constant 0 : index
    %158 = vector.load %arg4[%c1_53, %c0_54, %c0_55] : memref<2x32x32xf32, #tpu.memory_space<vmem>>, vector<1x32x32xf32>
    %159 = vector.shape_cast %158 : vector<1x32x32xf32> to vector<32x32xf32>
    %c1_56 = arith.constant 1 : index
    %c0_57 = arith.constant 0 : index
    %c0_58 = arith.constant 0 : index
    %160 = vector.load %arg5[%c1_56, %c0_57, %c0_58] : memref<2x32x64xf32, #tpu.memory_space<vmem>>, vector<1x32x64xf32>
    %161 = vector.shape_cast %160 : vector<1x32x64xf32> to vector<32x64xf32>
    %c1_59 = arith.constant 1 : index
    %c0_60 = arith.constant 0 : index
    %c0_61 = arith.constant 0 : index
    %162 = vector.load %arg6[%c1_59, %c0_60, %c0_61] : memref<2x64x32xf32, #tpu.memory_space<vmem>>, vector<1x64x32xf32>
    %163 = vector.shape_cast %162 : vector<1x64x32xf32> to vector<64x32xf32>
    %c1_62 = arith.constant 1 : index
    %c0_63 = arith.constant 0 : index
    %c0_64 = arith.constant 0 : index
    %164 = vector.load %arg7[%c1_62, %c0_63, %c0_64] : memref<2x7x64xf32, #tpu.memory_space<vmem>>, vector<1x7x64xf32>
    %165 = vector.shape_cast %164 : vector<1x7x64xf32> to vector<7x64xf32>
    %166 = vector.extract_strided_slice %165 {offsets = [0, 0], sizes = [1, 32], strides = [1, 1]} : vector<7x64xf32> to vector<1x32xf32>
    %167 = vector.extract_strided_slice %165 {offsets = [1, 0], sizes = [1, 32], strides = [1, 1]} : vector<7x64xf32> to vector<1x32xf32>
    %168 = vector.extract_strided_slice %165 {offsets = [2, 0], sizes = [1, 32], strides = [1, 1]} : vector<7x64xf32> to vector<1x32xf32>
    %169 = vector.extract_strided_slice %165 {offsets = [3, 0], sizes = [1, 32], strides = [1, 1]} : vector<7x64xf32> to vector<1x32xf32>
    %170 = vector.extract_strided_slice %165 {offsets = [4, 0], sizes = [1, 32], strides = [1, 1]} : vector<7x64xf32> to vector<1x32xf32>
    %171 = vector.extract_strided_slice %165 {offsets = [5, 0], sizes = [1, 32], strides = [1, 1]} : vector<7x64xf32> to vector<1x32xf32>
    %172 = vector.extract_strided_slice %165 {offsets = [6, 0], sizes = [1, 64], strides = [1, 1]} : vector<7x64xf32> to vector<1x64xf32>
    %cst_65 = arith.constant dense<0.000000e+00> : vector<16x96xf32>
    %173 = tpu.matmul %155, %157, %cst_65 {dimension_numbers = #tpu.dot_dimension_numbers<[1], [0], [0], [1], [0, 0, 1, 1], [], []>} : vector<16x32xf32>, vector<32x96xf32>, vector<16x96xf32> -> vector<16x96xf32>
    %174 = vector.extract_strided_slice %173 {offsets = [0, 0], sizes = [16, 32], strides = [1, 1]} : vector<16x96xf32> to vector<16x32xf32>
    %175 = vector.shape_cast %174 : vector<16x32xf32> to vector<2x8x32xf32>
    %176 = vector.extract_strided_slice %173 {offsets = [0, 32], sizes = [16, 32], strides = [1, 1]} : vector<16x96xf32> to vector<16x32xf32>
    %177 = vector.shape_cast %176 : vector<16x32xf32> to vector<2x8x32xf32>
    %178 = vector.extract_strided_slice %173 {offsets = [0, 64], sizes = [16, 32], strides = [1, 1]} : vector<16x96xf32> to vector<16x32xf32>
    %179 = vector.shape_cast %178 : vector<16x32xf32> to vector<2x8x32xf32>
    %180 = vector.extract_strided_slice %175 {offsets = [0, 0, 0], sizes = [2, 8, 8], strides = [1, 1, 1]} : vector<2x8x32xf32> to vector<2x8x8xf32>
    %181 = vector.extract_strided_slice %177 {offsets = [0, 0, 0], sizes = [2, 8, 8], strides = [1, 1, 1]} : vector<2x8x32xf32> to vector<2x8x8xf32>
    %182 = vector.extract_strided_slice %179 {offsets = [0, 0, 0], sizes = [2, 8, 8], strides = [1, 1, 1]} : vector<2x8x32xf32> to vector<2x8x8xf32>
    "tpu.trace_start"() <{level = 10 : i32, message = "nqd,nkd->nqk"}> : () -> ()
    %cst_66 = arith.constant dense<0.000000e+00> : vector<2x8x8xf32>
    %183 = tpu.matmul %180, %181, %cst_66 {dimension_numbers = #tpu.dot_dimension_numbers<[2], [2], [1], [1], [0, 0, 0, 1, 1, 1], [0], [0]>} : vector<2x8x8xf32>, vector<2x8x8xf32>, vector<2x8x8xf32> -> vector<2x8x8xf32>
    "tpu.trace_stop"() : () -> ()
    %cst_67 = arith.constant dense<0xFF800000> : vector<2x8xf32>
    %184 = vector.multi_reduction <maximumf>, %183, %cst_67 [2] : vector<2x8x8xf32> to vector<2x8xf32>
    %185 = vector.shape_cast %184 : vector<2x8xf32> to vector<2x8x1xf32>
    %186 = vector.broadcast %185 : vector<2x8x1xf32> to vector<2x8x8xf32>
    %187 = arith.subf %183, %186 : vector<2x8x8xf32>
    %188 = math.exp %187 : vector<2x8x8xf32>
    %cst_68 = arith.constant dense<0.000000e+00> : vector<2x8xf32>
    %189 = vector.multi_reduction <add>, %188, %cst_68 [2] : vector<2x8x8xf32> to vector<2x8xf32>
    %190 = vector.shape_cast %189 : vector<2x8xf32> to vector<2x8x1xf32>
    %191 = vector.broadcast %190 : vector<2x8x1xf32> to vector<2x8x8xf32>
    %192 = arith.divf %188, %191 : vector<2x8x8xf32>
    "tpu.trace_start"() <{level = 10 : i32, message = "nqk,nkd->nqd"}> : () -> ()
    %cst_69 = arith.constant dense<0.000000e+00> : vector<2x8x8xf32>
    %193 = tpu.matmul %192, %182, %cst_69 {dimension_numbers = #tpu.dot_dimension_numbers<[2], [1], [1], [2], [0, 0, 0, 1, 1, 2], [0], [0]>} : vector<2x8x8xf32>, vector<2x8x8xf32>, vector<2x8x8xf32> -> vector<2x8x8xf32>
    "tpu.trace_stop"() : () -> ()
    %194 = vector.shape_cast %193 : vector<2x8x8xf32> to vector<16x8xf32>
    %195 = vector.extract_strided_slice %175 {offsets = [0, 0, 8], sizes = [2, 8, 8], strides = [1, 1, 1]} : vector<2x8x32xf32> to vector<2x8x8xf32>
    %196 = vector.extract_strided_slice %177 {offsets = [0, 0, 8], sizes = [2, 8, 8], strides = [1, 1, 1]} : vector<2x8x32xf32> to vector<2x8x8xf32>
    %197 = vector.extract_strided_slice %179 {offsets = [0, 0, 8], sizes = [2, 8, 8], strides = [1, 1, 1]} : vector<2x8x32xf32> to vector<2x8x8xf32>
    "tpu.trace_start"() <{level = 10 : i32, message = "nqd,nkd->nqk"}> : () -> ()
    %cst_70 = arith.constant dense<0.000000e+00> : vector<2x8x8xf32>
    %198 = tpu.matmul %195, %196, %cst_70 {dimension_numbers = #tpu.dot_dimension_numbers<[2], [2], [1], [1], [0, 0, 0, 1, 1, 1], [0], [0]>} : vector<2x8x8xf32>, vector<2x8x8xf32>, vector<2x8x8xf32> -> vector<2x8x8xf32>
    "tpu.trace_stop"() : () -> ()
    %cst_71 = arith.constant dense<0xFF800000> : vector<2x8xf32>
    %199 = vector.multi_reduction <maximumf>, %198, %cst_71 [2] : vector<2x8x8xf32> to vector<2x8xf32>
    %200 = vector.shape_cast %199 : vector<2x8xf32> to vector<2x8x1xf32>
    %201 = vector.broadcast %200 : vector<2x8x1xf32> to vector<2x8x8xf32>
    %202 = arith.subf %198, %201 : vector<2x8x8xf32>
    %203 = math.exp %202 : vector<2x8x8xf32>
    %cst_72 = arith.constant dense<0.000000e+00> : vector<2x8xf32>
    %204 = vector.multi_reduction <add>, %203, %cst_72 [2] : vector<2x8x8xf32> to vector<2x8xf32>
    %205 = vector.shape_cast %204 : vector<2x8xf32> to vector<2x8x1xf32>
    %206 = vector.broadcast %205 : vector<2x8x1xf32> to vector<2x8x8xf32>
    %207 = arith.divf %203, %206 : vector<2x8x8xf32>
    "tpu.trace_start"() <{level = 10 : i32, message = "nqk,nkd->nqd"}> : () -> ()
    %cst_73 = arith.constant dense<0.000000e+00> : vector<2x8x8xf32>
    %208 = tpu.matmul %207, %197, %cst_73 {dimension_numbers = #tpu.dot_dimension_numbers<[2], [1], [1], [2], [0, 0, 0, 1, 1, 2], [0], [0]>} : vector<2x8x8xf32>, vector<2x8x8xf32>, vector<2x8x8xf32> -> vector<2x8x8xf32>
    "tpu.trace_stop"() : () -> ()
    %209 = vector.shape_cast %208 : vector<2x8x8xf32> to vector<16x8xf32>
    %210 = vector.extract_strided_slice %175 {offsets = [0, 0, 16], sizes = [2, 8, 8], strides = [1, 1, 1]} : vector<2x8x32xf32> to vector<2x8x8xf32>
    %211 = vector.extract_strided_slice %177 {offsets = [0, 0, 16], sizes = [2, 8, 8], strides = [1, 1, 1]} : vector<2x8x32xf32> to vector<2x8x8xf32>
    %212 = vector.extract_strided_slice %179 {offsets = [0, 0, 16], sizes = [2, 8, 8], strides = [1, 1, 1]} : vector<2x8x32xf32> to vector<2x8x8xf32>
    "tpu.trace_start"() <{level = 10 : i32, message = "nqd,nkd->nqk"}> : () -> ()
    %cst_74 = arith.constant dense<0.000000e+00> : vector<2x8x8xf32>
    %213 = tpu.matmul %210, %211, %cst_74 {dimension_numbers = #tpu.dot_dimension_numbers<[2], [2], [1], [1], [0, 0, 0, 1, 1, 1], [0], [0]>} : vector<2x8x8xf32>, vector<2x8x8xf32>, vector<2x8x8xf32> -> vector<2x8x8xf32>
    "tpu.trace_stop"() : () -> ()
    %cst_75 = arith.constant dense<0xFF800000> : vector<2x8xf32>
    %214 = vector.multi_reduction <maximumf>, %213, %cst_75 [2] : vector<2x8x8xf32> to vector<2x8xf32>
    %215 = vector.shape_cast %214 : vector<2x8xf32> to vector<2x8x1xf32>
    %216 = vector.broadcast %215 : vector<2x8x1xf32> to vector<2x8x8xf32>
    %217 = arith.subf %213, %216 : vector<2x8x8xf32>
    %218 = math.exp %217 : vector<2x8x8xf32>
    %cst_76 = arith.constant dense<0.000000e+00> : vector<2x8xf32>
    %219 = vector.multi_reduction <add>, %218, %cst_76 [2] : vector<2x8x8xf32> to vector<2x8xf32>
    %220 = vector.shape_cast %219 : vector<2x8xf32> to vector<2x8x1xf32>
    %221 = vector.broadcast %220 : vector<2x8x1xf32> to vector<2x8x8xf32>
    %222 = arith.divf %218, %221 : vector<2x8x8xf32>
    "tpu.trace_start"() <{level = 10 : i32, message = "nqk,nkd->nqd"}> : () -> ()
    %cst_77 = arith.constant dense<0.000000e+00> : vector<2x8x8xf32>
    %223 = tpu.matmul %222, %212, %cst_77 {dimension_numbers = #tpu.dot_dimension_numbers<[2], [1], [1], [2], [0, 0, 0, 1, 1, 2], [0], [0]>} : vector<2x8x8xf32>, vector<2x8x8xf32>, vector<2x8x8xf32> -> vector<2x8x8xf32>
    "tpu.trace_stop"() : () -> ()
    %224 = vector.shape_cast %223 : vector<2x8x8xf32> to vector<16x8xf32>
    %225 = vector.extract_strided_slice %175 {offsets = [0, 0, 24], sizes = [2, 8, 8], strides = [1, 1, 1]} : vector<2x8x32xf32> to vector<2x8x8xf32>
    %226 = vector.extract_strided_slice %177 {offsets = [0, 0, 24], sizes = [2, 8, 8], strides = [1, 1, 1]} : vector<2x8x32xf32> to vector<2x8x8xf32>
    %227 = vector.extract_strided_slice %179 {offsets = [0, 0, 24], sizes = [2, 8, 8], strides = [1, 1, 1]} : vector<2x8x32xf32> to vector<2x8x8xf32>
    "tpu.trace_start"() <{level = 10 : i32, message = "nqd,nkd->nqk"}> : () -> ()
    %cst_78 = arith.constant dense<0.000000e+00> : vector<2x8x8xf32>
    %228 = tpu.matmul %225, %226, %cst_78 {dimension_numbers = #tpu.dot_dimension_numbers<[2], [2], [1], [1], [0, 0, 0, 1, 1, 1], [0], [0]>} : vector<2x8x8xf32>, vector<2x8x8xf32>, vector<2x8x8xf32> -> vector<2x8x8xf32>
    "tpu.trace_stop"() : () -> ()
    %cst_79 = arith.constant dense<0xFF800000> : vector<2x8xf32>
    %229 = vector.multi_reduction <maximumf>, %228, %cst_79 [2] : vector<2x8x8xf32> to vector<2x8xf32>
    %230 = vector.shape_cast %229 : vector<2x8xf32> to vector<2x8x1xf32>
    %231 = vector.broadcast %230 : vector<2x8x1xf32> to vector<2x8x8xf32>
    %232 = arith.subf %228, %231 : vector<2x8x8xf32>
    %233 = math.exp %232 : vector<2x8x8xf32>
    %cst_80 = arith.constant dense<0.000000e+00> : vector<2x8xf32>
    %234 = vector.multi_reduction <add>, %233, %cst_80 [2] : vector<2x8x8xf32> to vector<2x8xf32>
    %235 = vector.shape_cast %234 : vector<2x8xf32> to vector<2x8x1xf32>
    %236 = vector.broadcast %235 : vector<2x8x1xf32> to vector<2x8x8xf32>
    %237 = arith.divf %233, %236 : vector<2x8x8xf32>
    "tpu.trace_start"() <{level = 10 : i32, message = "nqk,nkd->nqd"}> : () -> ()
    %cst_81 = arith.constant dense<0.000000e+00> : vector<2x8x8xf32>
    %238 = tpu.matmul %237, %227, %cst_81 {dimension_numbers = #tpu.dot_dimension_numbers<[2], [1], [1], [2], [0, 0, 0, 1, 1, 2], [0], [0]>} : vector<2x8x8xf32>, vector<2x8x8xf32>, vector<2x8x8xf32> -> vector<2x8x8xf32>
    "tpu.trace_stop"() : () -> ()
    %239 = vector.shape_cast %238 : vector<2x8x8xf32> to vector<16x8xf32>
    %240 = tpu.concatenate %194, %209, %224, %239 in 1 : vector<16x8xf32>, vector<16x8xf32>, vector<16x8xf32>, vector<16x8xf32> -> vector<16x32xf32>
    %cst_82 = arith.constant dense<0.000000e+00> : vector<16x32xf32>
    %241 = tpu.matmul %240, %159, %cst_82 {dimension_numbers = #tpu.dot_dimension_numbers<[1], [0], [0], [1], [0, 0, 1, 1], [], []>} : vector<16x32xf32>, vector<32x32xf32>, vector<16x32xf32> -> vector<16x32xf32>
    %242 = vector.broadcast %166 : vector<1x32xf32> to vector<16x32xf32>
    %243 = arith.addf %241, %242 : vector<16x32xf32>
    %244 = arith.addf %243, %155 : vector<16x32xf32>
    %cst_83 = arith.constant dense<0.000000e+00> : vector<16xf32>
    %245 = vector.multi_reduction <add>, %244, %cst_83 [1] : vector<16x32xf32> to vector<16xf32>
    %246 = vector.shape_cast %245 : vector<16xf32> to vector<16x1xf32>
    %cst_84 = arith.constant 3.200000e+01 : f32
    %247 = vector.broadcast %cst_84 : f32 to vector<16x1xf32>
    %248 = arith.divf %246, %247 : vector<16x1xf32>
    %249 = vector.broadcast %248 : vector<16x1xf32> to vector<16x32xf32>
    %250 = arith.subf %244, %249 : vector<16x32xf32>
    %251 = arith.mulf %250, %250 : vector<16x32xf32>
    %cst_85 = arith.constant dense<0.000000e+00> : vector<16xf32>
    %252 = vector.multi_reduction <add>, %251, %cst_85 [1] : vector<16x32xf32> to vector<16xf32>
    %253 = vector.shape_cast %252 : vector<16xf32> to vector<16x1xf32>
    %cst_86 = arith.constant 3.200000e+01 : f32
    %254 = vector.broadcast %cst_86 : f32 to vector<16x1xf32>
    %255 = arith.divf %253, %254 : vector<16x1xf32>
    %256 = vector.broadcast %248 : vector<16x1xf32> to vector<16x32xf32>
    %257 = arith.subf %244, %256 : vector<16x32xf32>
    %cst_87 = arith.constant 9.99999974E-6 : f32
    %258 = vector.broadcast %cst_87 : f32 to vector<16x1xf32>
    %259 = arith.addf %255, %258 : vector<16x1xf32>
    %260 = math.rsqrt %259 : vector<16x1xf32>
    %261 = vector.broadcast %260 : vector<16x1xf32> to vector<16x32xf32>
    %262 = arith.mulf %257, %261 : vector<16x32xf32>
    %263 = vector.broadcast %167 : vector<1x32xf32> to vector<16x32xf32>
    %264 = arith.mulf %262, %263 : vector<16x32xf32>
    %265 = vector.broadcast %168 : vector<1x32xf32> to vector<16x32xf32>
    %266 = arith.addf %264, %265 : vector<16x32xf32>
    %cst_88 = arith.constant dense<0.000000e+00> : vector<16x64xf32>
    %267 = tpu.matmul %266, %161, %cst_88 {dimension_numbers = #tpu.dot_dimension_numbers<[1], [0], [0], [1], [0, 0, 1, 1], [], []>} : vector<16x32xf32>, vector<32x64xf32>, vector<16x64xf32> -> vector<16x64xf32>
    %268 = vector.broadcast %172 : vector<1x64xf32> to vector<16x64xf32>
    %269 = arith.addf %267, %268 : vector<16x64xf32>
    %cst_89 = arith.constant 0.000000e+00 : f32
    %270 = vector.broadcast %cst_89 : f32 to vector<16x64xf32>
    %271 = arith.maximumf %269, %270 : vector<16x64xf32>
    %cst_90 = arith.constant dense<0.000000e+00> : vector<16x32xf32>
    %272 = tpu.matmul %271, %163, %cst_90 {dimension_numbers = #tpu.dot_dimension_numbers<[1], [0], [0], [1], [0, 0, 1, 1], [], []>} : vector<16x64xf32>, vector<64x32xf32>, vector<16x32xf32> -> vector<16x32xf32>
    %273 = vector.broadcast %169 : vector<1x32xf32> to vector<16x32xf32>
    %274 = arith.addf %272, %273 : vector<16x32xf32>
    %275 = arith.addf %274, %266 : vector<16x32xf32>
    %cst_91 = arith.constant dense<0.000000e+00> : vector<16xf32>
    %276 = vector.multi_reduction <add>, %275, %cst_91 [1] : vector<16x32xf32> to vector<16xf32>
    %277 = vector.shape_cast %276 : vector<16xf32> to vector<16x1xf32>
    %cst_92 = arith.constant 3.200000e+01 : f32
    %278 = vector.broadcast %cst_92 : f32 to vector<16x1xf32>
    %279 = arith.divf %277, %278 : vector<16x1xf32>
    %280 = vector.broadcast %279 : vector<16x1xf32> to vector<16x32xf32>
    %281 = arith.subf %275, %280 : vector<16x32xf32>
    %282 = arith.mulf %281, %281 : vector<16x32xf32>
    %cst_93 = arith.constant dense<0.000000e+00> : vector<16xf32>
    %283 = vector.multi_reduction <add>, %282, %cst_93 [1] : vector<16x32xf32> to vector<16xf32>
    %284 = vector.shape_cast %283 : vector<16xf32> to vector<16x1xf32>
    %cst_94 = arith.constant 3.200000e+01 : f32
    %285 = vector.broadcast %cst_94 : f32 to vector<16x1xf32>
    %286 = arith.divf %284, %285 : vector<16x1xf32>
    %287 = vector.broadcast %279 : vector<16x1xf32> to vector<16x32xf32>
    %288 = arith.subf %275, %287 : vector<16x32xf32>
    %cst_95 = arith.constant 9.99999974E-6 : f32
    %289 = vector.broadcast %cst_95 : f32 to vector<16x1xf32>
    %290 = arith.addf %286, %289 : vector<16x1xf32>
    %291 = math.rsqrt %290 : vector<16x1xf32>
    %292 = vector.broadcast %291 : vector<16x1xf32> to vector<16x32xf32>
    %293 = arith.mulf %288, %292 : vector<16x32xf32>
    %294 = vector.broadcast %170 : vector<1x32xf32> to vector<16x32xf32>
    %295 = arith.mulf %293, %294 : vector<16x32xf32>
    %296 = vector.broadcast %171 : vector<1x32xf32> to vector<16x32xf32>
    %297 = arith.addf %295, %296 : vector<16x32xf32>
    %c0_96 = arith.constant 0 : index
    %c0_97 = arith.constant 0 : index
    %298 = vector.load %arg8[%c0_96, %c0_97] : memref<16x32xf32, #tpu.memory_space<vmem>>, vector<16x32xf32>
    tpu.vector_store %arg8[%c0_96, %c0_97], %297 {strides = array<i32>} : memref<16x32xf32, #tpu.memory_space<vmem>>, vector<16x32xf32>,
    return
  }
}

</mosaic_0001>

<bundles_post_ra>
// kernel: encoder_forward.1
= control target key start
LH: loop header
LB: loop body
LE: loop exit
PB: predicated region body
PF: predicated region fallthrough
CT: control target
= control target key end

     0   :  { %v4506_v2 = vmov 0   ;;  %s5198_s0 = inlined_call_operand.vmem [shape: s32[16,1], index: 0, kind: input, shape index: {}]   ;;  %s5199_s1 = inlined_call_operand.vmem [shape: f32[128,32], index: 1, kind: input, shape index: {}]   ;;  %s5200_s2 = inlined_call_operand.vmem [shape: f32[8,32], index: 2, kind: input, shape index: {}]   ;;  %s5201_s3 = inlined_call_operand.vmem [shape: f32[2,32,96], index: 3, kind: input, shape index: {}]   ;;  %s5202_s4 = inlined_call_operand.vmem [shape: f32[2,32,32], index: 4, kind: input, shape index: {}]   ;;  %s5203_s5 = inlined_call_operand.vmem [shape: f32[2,32,64], index: 5, kind: input, shape index: {}]   ;;  %s5204_s6 = inlined_call_operand.vmem [shape: f32[2,64,32], index: 6, kind: input, shape index: {}]   ;;  %s5205_s7 = inlined_call_operand.vmem [shape: f32[2,7,64], index: 7, kind: input, shape index: {}]   ;;  %s5206_s8 = inlined_call_operand.hbm [shape: f32[16,32], index: 8, kind: output, shape index: {}]  }
   0x1   :  { %v30_v0 = vld [vmem:[%s5198_s0] sm:$0xff]  ;;  %4401 = vset.pattern.permute.xlu0 %v4506_v2  ;;  %v47_v3 = vld [vmem:[%s5199_s1 + $0x8] sm:$0xff]  ;;  %v48_v4 = vld [vmem:[%s5199_s1 + $0x10] sm:$0xff] }
   0x2   :  { %v46_v1 = vld [vmem:[%s5199_s1] sm:$0xff]  ;;  %v49_v5 = vld [vmem:[%s5199_s1 + $0x18] sm:$0xff]  ;;  %35 = vperm.xlu0 %4401, %v30_v0   ;;  %v31_v8 = vld [vmem:[%s5198_s0 + $0x8] sm:$0xff] }
   0x3   :  { %v4269_v6 = vpack.c.bf16 %v47_v3, %v46_v1  ;;  %v4273_v7 = vpack.c.bf16 %v49_v5, %v48_v4  ;;  %v50_v9 = vld [vmem:[%s5199_s1 + $0x20] sm:$0xff]  ;;  %v51_v10 = vld [vmem:[%s5199_s1 + $0x28] sm:$0xff]  ;;  %v52_v12 = vld [vmem:[%s5199_s1 + $0x30] sm:$0xff] }
   0x4   :  { %v4277_v11 = vpack.c.bf16 %v51_v10, %v50_v9 }
   0x5   :  { %4270 = vmatprep.subr.bf16.mxu0 %v4269_v6 }
   0x6   :  { %4272 = vmatpush3.bf16.msra.mxu0 %v4269_v6  ;;  %38 = vperm.xlu0 %4401, %v31_v8  }
   0x7   :  { %4274 = vmatprep.subr.bf16.mxu0 %v4273_v7 }
   0x8   :  { %13 = vsyncpa [#allocation3], 0  ;;  %v53_v13 = vld [vmem:[%s5199_s1 + $0x38] sm:$0xff]  ;;  %v140_v14 = vld [vmem:[%s5201_s3] sm:$0xff]  ;;  %v32_v30 = vlaneseq  ;;  %v4507_v33 = vmov 1.0   ;;  %vm161_vm2 = vcmask 261120  }
   0x9   :  { %v141_v15 = vld [vmem:[%s5201_s3 + $0x8] sm:$0xff]  ;;  %v4281_v17 = vpack.c.bf16 %v53_v13, %v52_v12  ;;  %v54_v18 = vld [vmem:[%s5199_s1 + $0x40] sm:$0xff]  ;;  %v56_v21 = vld [vmem:[%s5199_s1 + $0x50] sm:$0xff]  ;;  %v4508_v43 = vmov 0.0   ;;  %vm4509_vm3 = vmmov 0   ;;  %vm246_vm4 = vcmask 64512  }
   0xa   :  { %v4301_v16 = vpack.c.bf16 %v141_v15, %v140_v14  ;;  %4276 = vmatpush3.bf16.msra.mxu0 %v4273_v7  ;;  %v55_v19 = vld [vmem:[%s5199_s1 + $0x48] sm:$0xff]  ;;  %v57_v22 = vld [vmem:[%s5199_s1 + $0x58] sm:$0xff]  ;;  %v58_v24 = vld [vmem:[%s5199_s1 + $0x60] sm:$0xff]  ;;  %v33_v31 = vand.u32 127, %v32_v30  ;;  %s4511_s26 = smov 64   ;;  %s4512_s27 = smov 88  }
   0xb   :  { %4278 = vmatprep.subr.bf16.mxu0 %v4277_v11  ;;  %v4285_v20 = vpack.c.bf16 %v55_v19, %v54_v18  ;;  %v4289_v23 = vpack.c.bf16 %v57_v22, %v56_v21  ;;  %v59_v25 = vld [vmem:[%s5199_s1 + $0x68] sm:$0xff]  ;;  %v60_v27 = vld [vmem:[%s5199_s1 + $0x70] sm:$0xff]  ;;  %v61_v28 = vld [vmem:[%s5199_s1 + $0x78] sm:$0xff]  ;;  %s4513_s28 = smov 120   ;;  %s4514_s29 = smov 56   ;;  %vm1591_vm5 = vcmask 195584  }
   0xc   :  { %4302 = vmatprep.subr.bf16.mxu1 %v4301_v16  ;;  %v4293_v26 = vpack.c.bf16 %v59_v25, %v58_v24  ;;  %v4297_v29 = vpack.c.bf16 %v61_v28, %v60_v27  ;;  %v142_v35 = vld [vmem:[%s5201_s3 + $0x10] sm:$0xff]  ;;  %v143_v36 = vld [vmem:[%s5201_s3 + $0x18] sm:$0xff]  ;;  %v137_v38 = vld [vmem:[%s5200_s2] sm:$0xff]  ;;  %s4510_s2 = smov 96   ;;  %s4515_s30 = smov 80   ;;  %vm1588_vm6 = vcmask 130048  }
   0xd   :  { %4304 = vmatpush3.bf16.msra.mxu1 %v4301_v16  ;;  %v4305_v37 = vpack.c.bf16 %v143_v36, %v142_v35  ;;  %s4516_s9 = smov 112   ;;  %s4517_s10 = smov 48   ;;  %vm1811_vm7 = vcmask 523264  }
   0xe   :  { %4280 = vmatpush3.bf16.msra.mxu0 %v4277_v11  ;;  %s4518_s11 = smov 72   ;;  %s4519_s12 = smov 104  }
   0xf   :  { %4282 = vmatprep.subr.bf16.mxu0 %v4281_v17  ;;  %4306 = vmatprep.subr.bf16.mxu1 %v4305_v37  ;;  %s4520_s13 = smov 40   ;;  %s4521_s14 = smov 8  }
  0x10   :  { %s4522_s15 = smov 16   ;;  %s4523_s1 = smov 24  }
  0x11   :  { %4308 = vmatpush3.bf16.msra.mxu1 %v4305_v37 }
  0x12   :  { %4284 = vmatpush3.bf16.msra.mxu0 %v4281_v17  ;;  %4016 = vmatprep.subr.mxu1 %v4508_v43 }
  0x13   :  { %4286 = vmatprep.subr.bf16.mxu0 %v4285_v20 }
  0x16   :  { %4288 = vmatpush3.bf16.msra.mxu0 %v4285_v20 }
  0x17   :  { %4290 = vmatprep.subr.bf16.mxu0 %v4289_v23 }
  0x1a   :  { %4292 = vmatpush3.bf16.msra.mxu0 %v4289_v23 }
  0x1b   :  { %4294 = vmatprep.subr.bf16.mxu0 %v4293_v26 }
  0x1e   :  { %4296 = vmatpush3.bf16.msra.mxu0 %v4293_v26 }
  0x1f   :  { %4298 = vmatprep.subr.bf16.mxu0 %v4297_v29 }
  0x22   :  { %4300 = vmatpush3.bf16.msra.mxu0 %v4297_v29 }
  0x23   :  { %4046 = vmatprep.subr.mxu0 %v4508_v43 }
  0x81   :  { %v36_v32 = vpop.permute.xlu0 %35 }
  0x82   :  { %vm40_vm0 = vcmp.eq.s32.totalorder %v33_v31, %v36_v32 }
  0x83   :  { %4002 = vmatprep.mubr.msk.f32.mxu0 %vm40_vm0, %v4507_v33 }
  0x85   :  { %v39_v34 = vpop.permute.xlu0 %38 }
  0x86   :  { %vm41_vm1 = vcmp.eq.s32.totalorder %v33_v31, %v39_v34 }
  0x87   :  { %4003 = vmatmul.mubr.msk.f32.vlgmr.msra.gmra.mrb[0].mxu0 %vm41_vm1, %v4507_v33 }
  0x88   :  { %4048 = vmatprep.mubr.msk.f32.mxu0 %vm4509_vm3, %v4508_v43 }
 0x15a   :  { %v4004_v39 = vpop.f32.mrb[0].mxu0 }
 0x15b   :  { %v128_v40 = vpop.f32.mrb[1].mxu0  ;;  %v4643_v42 = vadd.f32 %v4004_v39, %v137_v38 }
 0x15c   :  { %v4641_v41 = vadd.f32 %v137_v38, %v128_v40 }
 0x15e   :  { %4013 = vmatprep.mubr.msk.f32.mxu1 %vm161_vm2, %v4641_v41 }
 0x15f   :  { %4014 = vmatmul.mubr.msk.f32.vlgmr.msra.gmra.mrb[0].mxu1 %vm161_vm2, %v4643_v42 }
 0x160   :  { %4018 = vmatprep.mubr.msk.f32.mxu1 %vm4509_vm3, %v4508_v43 }
 0x232   :  { %v4655_v44 = vpop.f32.mrb[0].mxu1 }
 0x233   :  { %v4657_v45 = vpop.f32.mrb[1].mxu1 }
 0x234   :  { %244 = vrot.lane.b32.xlu1 %v4657_v45, %s4510_s2 }
 0x238   :  { %322 = vrot.lane.b32.xlu1 %v4655_v44, %s4510_s2 }
 0x2a6   :  { %v245_v46 = vpop.permute.xlu1 %244 }
 0x2a7   :  { %4017 = vmatpush3.xpose.msk.msra.mxu1 %vm246_vm4, %v245_v46 }
 0x2a8   :  { %4021 = vmatprep.subr.mxu1 %v4508_v43 }
 0x2aa   :  { %4019 = vmatmul.mubr.msk.f32.vlgmr.msra.gmra.mrb[2].mxu1 %vm246_vm4, %v4657_v45  ;;  %v323_v47 = vpop.permute.xlu1 %322 }
 0x2ab   :  { %4022 = vmatpush3.xpose.msk.msra.mxu1 %vm246_vm4, %v323_v47  ;;  %4023 = vmatprep.mubr.msk.f32.mxu1 %vm4509_vm3, %v4508_v43 }
 0x2ac   :  { %4026 = vmatprep.subr.mxu1 %v4508_v43 }
 0x2ae   :  { %4024 = vmatmul.mubr.msk.f32.vlgmr.msra.gmra.mrb[4].mxu1 %vm246_vm4, %v4655_v44 }
 0x2af   :  { %4028 = vmatprep.mubr.msk.f32.mxu1 %vm4509_vm3, %v4508_v43 }
 0x37d   :  { %v317_v48 = vpop.f32.mrb[2].mxu1 }
 0x37e   :  { %v4020_v49 = vpop.f32.mrb[3].mxu1  ;;  %v398_v50 = vsel %vm246_vm4, %v317_v48, -inf }
 0x37f   :  { %399 = vmax.xlane.f32.xlu0 %v398_v50 }
 0x381   :  { %v394_v51 = vpop.f32.mrb[4].mxu1 }
 0x382   :  { %v4025_v52 = vpop.f32.mrb[5].mxu1  ;;  %v401_v53 = vsel %vm246_vm4, %v394_v51, -inf }
 0x383   :  { %402 = vmax.xlane.f32.xlu1 %v401_v53 }
 0x394   :  { %420 = vrot.lane.b32.xlu1 %v4657_v45, %s4511_s26 }
 0x398   :  { %574 = vrot.lane.b32.xlu1 %v4657_v45, %s4512_s27 }
 0x39c   :  { %572 = vrot.lane.b32.xlu1 %v4657_v45, %s4513_s28 }
 0x3a0   :  { %650 = vrot.lane.b32.xlu1 %v4655_v44, %s4513_s28 }
 0x40c   :  { %v400_v54 = vpop.xlane.xlu0 %399 }
 0x40d   :  { %v404_v55 = vsub.f32 %v317_v48, %v400_v54 }
 0x40f   :  { %v406_v56 = vmul.f32 1.442695, %v404_v55 }
 0x410   :  { %v403_v57 = vpop.xlane.xlu1 %402 }
 0x411   :  { %4402 = vpow2.f32 %v406_v56  ;;  %v405_v58 = vsub.f32 %v394_v51, %v403_v57 }
 0x413   :  { %v408_v59 = vmul.f32 1.442695, %v405_v58 }
 0x414   :  { %v421_v60 = vpop.permute.xlu1 %420 }
 0x415   :  { %4404 = vpow2.f32 %v408_v59  ;;  %4027 = vmatpush3.msra.mxu1 %v421_v60 }
 0x416   :  { %4031 = vmatprep.subr.mxu1 %v4508_v43 }
 0x418   :  { %v575_v7 = vpop.permute.xlu1 %574 }
 0x41b   :  { %v4403_v61 = vpop.eup %4402 }
 0x41c   :  { %v410_v62 = vsel %vm246_vm4, %v4403_v61, 0.0  ;;  %v573_v9 = vpop.permute.xlu1 %572 }
 0x41d   :  { %411 = vadd.xlane.f32.xlu0 %v410_v62 }
 0x41f   :  { %v4405_v63 = vpop.eup %4404 }
 0x420   :  { %v413_v0 = vsel %vm246_vm4, %v4405_v63, 0.0  ;;  %v651_v11 = vpop.permute.xlu1 %650 }
 0x421   :  { %414 = vadd.xlane.f32.xlu0 %v413_v0 }
 0x437   :  { %496 = vrot.lane.b32.xlu0 %v4655_v44, %s4511_s26 }
 0x43b   :  { %652 = vrot.lane.b32.xlu0 %v4655_v44, %s4512_s27 }
 0x4aa   :  { %v412_v1 = vpop.xlane.xlu0 %411 }
 0x4ab   :  { %4406 = vrcp.f32 %v412_v1 }
 0x4ae   :  { %v415_v2 = vpop.xlane.xlu0 %414 }
 0x4af   :  { %4408 = vrcp.f32 %v415_v2 }
 0x4b2   :  { %v497_v5 = vpop.permute.xlu0 %496 }
 0x4b5   :  { %v4407_v3 = vpop.eup %4406 }
 0x4b6   :  { %v417_v4 = vmul.f32 %v4407_v3, %v4403_v61  ;;  %v653_v10 = vpop.permute.xlu0 %652 }
 0x4b8   :  { %4029 = vmatmul.mubr.msk.f32.vlgmr.msra.gmra.mrb[6].mxu1 %vm246_vm4, %v417_v4 }
 0x4b9   :  { %v4409_v6 = vpop.eup %4408  ;;  %4032 = vmatpush3.msra.mxu1 %v497_v5  ;;  %4033 = vmatprep.mubr.msk.f32.mxu1 %vm4509_vm3, %v4508_v43 }
 0x4ba   :  { %v419_v8 = vmul.f32 %v4409_v6, %v4405_v63  ;;  %4036 = vmatprep.subr.mxu1 %v4508_v43 }
 0x4bc   :  { %4034 = vmatmul.mubr.msk.f32.vlgmr.msra.gmra.mrb[8].mxu1 %vm246_vm4, %v419_v8 }
 0x4bd   :  { %4038 = vmatprep.mubr.msk.f32.mxu1 %vm4509_vm3, %v4508_v43 }
 0x4c0   :  { %4037 = vmatpush3.xpose.msk.msra.mxu1 %vm246_vm4, %v575_v7 }
 0x4c1   :  { %4041 = vmatprep.subr.mxu1 %v4508_v43 }
 0x4c3   :  { %4039 = vmatmul.mubr.msk.f32.vlgmr.msra.gmra.mrb[10].mxu1 %vm246_vm4, %v573_v9 }
 0x4c4   :  { %4042 = vmatpush3.xpose.msk.msra.mxu1 %vm246_vm4, %v653_v10  ;;  %4043 = vmatprep.mubr.msk.f32.mxu1 %vm4509_vm3, %v4508_v43 }
 0x4c5   :  { %4051 = vmatprep.subr.mxu1 %v4508_v43 }
 0x4c7   :  { %4044 = vmatmul.mubr.msk.f32.vlgmr.msra.gmra.mrb[12].mxu1 %vm246_vm4, %v651_v11 }
 0x4c8   :  { %4053 = vmatprep.mubr.msk.f32.mxu1 %vm4509_vm3, %v4508_v43 }
 0x58b   :  { %v4709_v12 = vpop.f32.mrb[6].mxu1 }
 0x58c   :  { %v4030_v13 = vpop.f32.mrb[7].mxu1 }
 0x58f   :  { %v4711_v14 = vpop.f32.mrb[8].mxu1 }
 0x590   :  { %v4035_v15 = vpop.f32.mrb[9].mxu1 }
 0x596   :  { %v646_v16 = vpop.f32.mrb[10].mxu1 }
 0x597   :  { %v4040_v17 = vpop.f32.mrb[11].mxu1  ;;  %v728_v18 = vsel %vm246_vm4, %v646_v16, -inf }
 0x598   :  { %729 = vmax.xlane.f32.xlu0 %v728_v18 }
 0x59a   :  { %v724_v19 = vpop.f32.mrb[12].mxu1 }
 0x59b   :  { %v4045_v20 = vpop.f32.mrb[13].mxu1  ;;  %v731_v21 = vsel %vm246_vm4, %v724_v19, -inf }
 0x59c   :  { %732 = vmax.xlane.f32.xlu1 %v731_v21 }
 0x5ad   :  { %750 = vrot.lane.b32.xlu1 %v4657_v45, %s4514_s29 }
 0x5ae   :  { %826 = vrot.lane.b32.xlu0 %v4655_v44, %s4514_s29 }
 0x5b1   :  { %904 = vrot.lane.b32.xlu1 %v4657_v45, %s4515_s30 }
 0x5b5   :  { %982 = vrot.lane.b32.xlu1 %v4655_v44, %s4515_s30 }
 0x5b9   :  { %980 = vrot.lane.b32.xlu1 %v4655_v44, %s4516_s9 }
 0x625   :  { %v730_v22 = vpop.xlane.xlu0 %729 }
 0x626   :  { %v734_v23 = vsub.f32 %v646_v16, %v730_v22 }
 0x628   :  { %v736_v24 = vmul.f32 1.442695, %v734_v23 }
 0x629   :  { %v827_v25 = vpop.permute.xlu0 %826  ;;  %v733_v26 = vpop.xlane.xlu1 %732 }
 0x62a   :  { %4410 = vpow2.f32 %v736_v24  ;;  %v735_v27 = vsub.f32 %v724_v19, %v733_v26  ;;  %4052 = vmatpush3.msra.mxu1 %v827_v25 }
 0x62b   :  { %4061 = vmatprep.subr.mxu1 %v4508_v43 }
 0x62c   :  { %v738_v28 = vmul.f32 1.442695, %v735_v27 }
 0x62d   :  { %v751_v29 = vpop.permute.xlu1 %750 }
 0x62e   :  { %4412 = vpow2.f32 %v738_v28  ;;  %4047 = vmatpush3.msra.mxu0 %v751_v29 }
 0x62f   :  { %4056 = vmatprep.subr.mxu0 %v4508_v43 }
 0x631   :  { %v905_v37 = vpop.permute.xlu1 %904 }
 0x634   :  { %v4411_v31 = vpop.eup %4410 }
 0x635   :  { %v740_v32 = vsel %vm246_vm4, %v4411_v31, 0.0  ;;  %v983_v46 = vpop.permute.xlu1 %982 }
 0x636   :  { %741 = vadd.xlane.f32.xlu0 %v740_v32 }
 0x638   :  { %v4413_v33 = vpop.eup %4412 }
 0x639   :  { %v743_v34 = vsel %vm246_vm4, %v4413_v33, 0.0  ;;  %v981_v49 = vpop.permute.xlu1 %980 }
 0x63a   :  { %744 = vadd.xlane.f32.xlu0 %v743_v34 }
 0x650   :  { %902 = vrot.lane.b32.xlu0 %v4657_v45, %s4516_s9 }
 0x6c3   :  { %v742_v35 = vpop.xlane.xlu0 %741 }
 0x6c4   :  { %4414 = vrcp.f32 %v742_v35 }
 0x6c7   :  { %v745_v36 = vpop.xlane.xlu0 %744 }
 0x6c8   :  { %4416 = vrcp.f32 %v745_v36 }
 0x6cb   :  { %v903_v48 = vpop.permute.xlu0 %902 }
 0x6ce   :  { %v4415_v38 = vpop.eup %4414 }
 0x6cf   :  { %v747_v39 = vmul.f32 %v4415_v38, %v4411_v31 }
 0x6d1   :  { %4049 = vmatmul.mubr.msk.f32.vlgmr.msra.gmra.mrb[2].mxu0 %vm246_vm4, %v747_v39 }
 0x6d2   :  { %v4417_v40 = vpop.eup %4416  ;;  %4057 = vmatpush3.xpose.msk.msra.mxu0 %vm246_vm4, %v905_v37  ;;  %4058 = vmatprep.mubr.msk.f32.mxu0 %vm4509_vm3, %v4508_v43 }
 0x6d3   :  { %v749_v47 = vmul.f32 %v4417_v40, %v4413_v33  ;;  %4066 = vmatprep.subr.mxu0 %v4508_v43 }
 0x6d5   :  { %4054 = vmatmul.mubr.msk.f32.vlgmr.msra.gmra.mrb[14].mxu1 %vm246_vm4, %v749_v47  ;;  %4059 = vmatmul.mubr.msk.f32.vlgmr.msra.gmra.mrb[4].mxu0 %vm246_vm4, %v903_v48 }
 0x6d6   :  { %4062 = vmatpush3.xpose.msk.msra.mxu1 %vm246_vm4, %v983_v46  ;;  %4063 = vmatprep.mubr.msk.f32.mxu1 %vm4509_vm3, %v4508_v43 }
 0x6d7   :  { %4071 = vmatprep.subr.mxu1 %v4508_v43  ;;  %4068 = vmatprep.mubr.msk.f32.mxu0 %vm4509_vm3, %v4508_v43 }
 0x6d9   :  { %4064 = vmatmul.mubr.msk.f32.vlgmr.msra.gmra.mrb[16].mxu1 %vm246_vm4, %v981_v49 }
 0x6da   :  { %4073 = vmatprep.mubr.msk.f32.mxu1 %vm4509_vm3, %v4508_v43 }
 0x7a4   :  { %v4747_v50 = vpop.f32.mrb[2].mxu0 }
 0x7a5   :  { %v4050_v51 = vpop.f32.mrb[3].mxu0 }
 0x7a8   :  { %v4749_v52 = vpop.f32.mrb[14].mxu1  ;;  %v976_v53 = vpop.f32.mrb[4].mxu0 }
 0x7a9   :  { %v4055_v54 = vpop.f32.mrb[15].mxu1  ;;  %v4060_v55 = vpop.f32.mrb[5].mxu0  ;;  %v1058_v56 = vsel %vm246_vm4, %v976_v53, -inf }
 0x7aa   :  { %1059 = vmax.xlane.f32.xlu0 %v1058_v56  ;;  %v146_v55 = vld [vmem:[%s5202_s4 + $0x10] sm:$0xff]  ;;  %v147_v56 = vld [vmem:[%s5202_s4 + $0x18] sm:$0xff] }
 0x7ac   :  { %v1054_v57 = vpop.f32.mrb[16].mxu1 }
 0x7ad   :  { %v4065_v58 = vpop.f32.mrb[17].mxu1  ;;  %v1061_v59 = vsel %vm246_vm4, %v1054_v57, -inf }
 0x7ae   :  { %1062 = vmax.xlane.f32.xlu1 %v1061_v59 }
 0x7bf   :  { %1080 = vrot.lane.b32.xlu1 %v4657_v45, %s4517_s10 }
 0x7c0   :  { %1156 = vrot.lane.b32.xlu0 %v4655_v44, %s4517_s10 }
 0x7c3   :  { %1234 = vrot.lane.b32.xlu1 %v4657_v45, %s4518_s11 }
 0x7c7   :  { %1312 = vrot.lane.b32.xlu1 %v4655_v44, %s4518_s11 }
 0x7cb   :  { %1310 = vrot.lane.b32.xlu1 %v4655_v44, %s4519_s12 }
 0x837   :  { %v1060_v60 = vpop.xlane.xlu0 %1059 }
 0x838   :  { %v1064_v61 = vsub.f32 %v976_v53, %v1060_v60  ;;  %v145_v53 = vld [vmem:[%s5202_s4 + $0x8] sm:$0xff] }
 0x83a   :  { %v1066_v62 = vmul.f32 1.442695, %v1064_v61 }
 0x83b   :  { %v1157_v63 = vpop.permute.xlu0 %1156  ;;  %v1063_v0 = vpop.xlane.xlu1 %1062 }
 0x83c   :  { %4418 = vpow2.f32 %v1066_v62  ;;  %v1065_v1 = vsub.f32 %v1054_v57, %v1063_v0  ;;  %4072 = vmatpush3.msra.mxu1 %v1157_v63  ;;  %v4313_v57 = vpack.c.bf16 %v147_v56, %v146_v55 }
 0x83d   :  { %4081 = vmatprep.subr.mxu1 %v4508_v43 }
 0x83e   :  { %v1068_v2 = vmul.f32 1.442695, %v1065_v1 }
 0x83f   :  { %v1081_v3 = vpop.permute.xlu1 %1080 }
 0x840   :  { %4420 = vpow2.f32 %v1068_v2  ;;  %4067 = vmatpush3.msra.mxu0 %v1081_v3 }
 0x841   :  { %4076 = vmatprep.subr.mxu0 %v4508_v43 }
 0x843   :  { %v1235_v10 = vpop.permute.xlu1 %1234 }
 0x846   :  { %v4419_v4 = vpop.eup %4418 }
 0x847   :  { %v1070_v5 = vsel %vm246_vm4, %v4419_v4, 0.0  ;;  %v1313_v16 = vpop.permute.xlu1 %1312 }
 0x848   :  { %1071 = vadd.xlane.f32.xlu0 %v1070_v5 }
 0x84a   :  { %v4421_v6 = vpop.eup %4420 }
 0x84b   :  { %v1073_v7 = vsel %vm246_vm4, %v4421_v6, 0.0  ;;  %v1311_v19 = vpop.permute.xlu1 %1310 }
 0x84c   :  { %1074 = vadd.xlane.f32.xlu0 %v1073_v7 }
 0x862   :  { %1232 = vrot.lane.b32.xlu0 %v4657_v45, %s4519_s12 }
 0x8d5   :  { %v1072_v8 = vpop.xlane.xlu0 %1071 }
 0x8d6   :  { %4422 = vrcp.f32 %v1072_v8 }
 0x8d9   :  { %v1075_v9 = vpop.xlane.xlu0 %1074 }
 0x8da   :  { %4424 = vrcp.f32 %v1075_v9 }
 0x8dd   :  { %v1233_v18 = vpop.permute.xlu0 %1232 }
 0x8e0   :  { %v4423_v11 = vpop.eup %4422 }
 0x8e1   :  { %v1077_v13 = vmul.f32 %v4423_v11, %v4419_v4  ;;  %v4832_v11 = vld [vmem:[%s5205_s7] sm:$0x7f] }
 0x8e3   :  { %4069 = vmatmul.mubr.msk.f32.vlgmr.msra.gmra.mrb[6].mxu0 %vm246_vm4, %v1077_v13 }
 0x8e4   :  { %v4425_v15 = vpop.eup %4424  ;;  %4077 = vmatpush3.xpose.msk.msra.mxu0 %vm246_vm4, %v1235_v10  ;;  %4078 = vmatprep.mubr.msk.f32.mxu0 %vm4509_vm3, %v4508_v43 }
 0x8e5   :  { %v1079_v17 = vmul.f32 %v4425_v15, %v4421_v6  ;;  %4086 = vmatprep.subr.mxu0 %v4508_v43 }
 0x8e7   :  { %4074 = vmatmul.mubr.msk.f32.vlgmr.msra.gmra.mrb[18].mxu1 %vm246_vm4, %v1079_v17  ;;  %4079 = vmatmul.mubr.msk.f32.vlgmr.msra.gmra.mrb[8].mxu0 %vm246_vm4, %v1233_v18 }
 0x8e8   :  { %4082 = vmatpush3.xpose.msk.msra.mxu1 %vm246_vm4, %v1313_v16  ;;  %4083 = vmatprep.mubr.msk.f32.mxu1 %vm4509_vm3, %v4508_v43 }
 0x8e9   :  { %4091 = vmatprep.subr.mxu1 %v4508_v43  ;;  %4088 = vmatprep.mubr.msk.f32.mxu0 %vm4509_vm3, %v4508_v43 }
 0x8eb   :  { %4084 = vmatmul.mubr.msk.f32.vlgmr.msra.gmra.mrb[20].mxu1 %vm246_vm4, %v1311_v19 }
 0x8ec   :  { %4093 = vmatprep.mubr.msk.f32.mxu1 %vm4509_vm3, %v4508_v43 }
 0x9b6   :  { %v1152_v20 = vpop.f32.mrb[6].mxu0 }
 0x9b7   :  { %v4070_v21 = vpop.f32.mrb[7].mxu0 }
 0x9ba   :  { %v1228_v22 = vpop.f32.mrb[18].mxu1  ;;  %v1306_v23 = vpop.f32.mrb[8].mxu0 }
 0x9bb   :  { %v4075_v24 = vpop.f32.mrb[19].mxu1  ;;  %v4080_v25 = vpop.f32.mrb[9].mxu0  ;;  %v1388_v26 = vsel %vm246_vm4, %v1306_v23, -inf }
 0x9bc   :  { %1389 = vmax.xlane.f32.xlu0 %v1388_v26 }
 0x9be   :  { %v1384_v27 = vpop.f32.mrb[20].mxu1 }
 0x9bf   :  { %v4085_v28 = vpop.f32.mrb[21].mxu1  ;;  %v1391_v29 = vsel %vm246_vm4, %v1384_v27, -inf }
 0x9c0   :  { %1392 = vmax.xlane.f32.xlu1 %v1391_v29 }
 0x9d1   :  { %1410 = vrot.lane.b32.xlu1 %v4657_v45, %s4520_s13 }
 0x9d5   :  { %1564 = vrot.lane.b32.xlu1 %v4747_v50, %s4521_s14 }
 0x9d9   :  { %1566 = vrot.lane.b32.xlu1 %v4749_v52, %s4521_s14 }
 0x9dd   :  { %1574 = vrot.lane.b32.xlu1 %v1228_v22, %s4522_s15 }
 0xa49   :  { %v1390_v31 = vpop.xlane.xlu0 %1389 }
 0xa4a   :  { %v1394_v32 = vsub.f32 %v1306_v23, %v1390_v31  ;;  %v149_v31 = vld [vmem:[%s5203_s5 + $0x8] sm:$0xff] }
 0xa4c   :  { %v1396_v33 = vmul.f32 1.442695, %v1394_v32 }
 0xa4d   :  { %v1393_v34 = vpop.xlane.xlu1 %1392 }
 0xa4e   :  { %4426 = vpow2.f32 %v1396_v33  ;;  %v1395_v35 = vsub.f32 %v1384_v27, %v1393_v34  ;;  %v150_v33 = vld [vmem:[%s5203_s5 + $0x10] sm:$0xff]  ;;  %v151_v34 = vld [vmem:[%s5203_s5 + $0x18] sm:$0xff] }
 0xa50   :  { %v1398_v36 = vmul.f32 1.442695, %v1395_v35  ;;  %v4321_v35 = vpack.c.bf16 %v151_v34, %v150_v33  ;;  %v3779_v34 = vld [vmem:[%s5201_s3 + $0x20] sm:$0xff] }
 0xa51   :  { %v1411_v37 = vpop.permute.xlu1 %1410 }
 0xa52   :  { %4428 = vpow2.f32 %v1398_v36  ;;  %4087 = vmatpush3.msra.mxu0 %v1411_v37  ;;  %v152_v36 = vld [vmem:[%s5204_s6] sm:$0xff]  ;;  %v153_v37 = vld [vmem:[%s5204_s6 + $0x8] sm:$0xff] }
 0xa55   :  { %v1565_v62 = vpop.permute.xlu1 %1564 }
 0xa56   :  { %v1586_v1 = vsel %vm246_vm4, %v4709_v12, %v1565_v62  ;;  %v4826_v12 = vshrl.u32 %v32_v30, 7 }
 0xa58   :  { %v4427_v45 = vpop.eup %4426  ;;  %v1596_v10 = vsub.s32 0, %v4826_v12  ;;  %v1716_v55 = vsub.s32 2, %v4826_v12 }
 0xa59   :  { %v1400_v38 = vsel %vm246_vm4, %v4427_v45, 0.0  ;;  %v1567_v63 = vpop.permute.xlu1 %1566 }
 0xa5a   :  { %1401 = vadd.xlane.f32.xlu0 %v1400_v38  ;;  %v1587_v6 = vsel %vm246_vm4, %v4711_v14, %v1567_v63  ;;  %v1597_v14 = vrot.slane %v4832_v11, %v1596_v10  ;;  %v4325_v38 = vpack.c.bf16 %v153_v37, %v152_v36  ;;  %v3781_v37 = vld [vmem:[%s5201_s3 + $0x30] sm:$0xff] }
 0xa5c   :  { %v4429_v39 = vpop.eup %4428  ;;  %4326 = vmatprep.subr.bf16.mxu0 %v4325_v38 }
 0xa5d   :  { %v1403_v40 = vsel %vm246_vm4, %v4429_v39, 0.0  ;;  %v1575_v2 = vpop.permute.xlu1 %1574 }
 0xa5e   :  { %1404 = vadd.xlane.f32.xlu0 %v1403_v40  ;;  %v1590_v7 = vsel %vm1588_vm6, %v1587_v6, %v1575_v2  ;;  %v158_v2 = vld [vmem:[%s5204_s6 + $0x30] sm:$0xff] }
 0xa74   :  { %1486 = vrot.lane.b32.xlu0 %v4655_v44, %s4520_s13  ;;  %v144_v44 = vld [vmem:[%s5202_s4] sm:$0xff] }
 0xa75   :  { %v4309_v54 = vpack.c.bf16 %v145_v53, %v144_v44 }
 0xa78   :  { %1572 = vrot.lane.b32.xlu0 %v1152_v20, %s4522_s15 }
 0xae7   :  { %v1402_v46 = vpop.xlane.xlu0 %1401 }
 0xae8   :  { %4430 = vrcp.f32 %v1402_v46  ;;  %v156_v46 = vld [vmem:[%s5204_s6 + $0x20] sm:$0xff] }
 0xaeb   :  { %v1405_v47 = vpop.xlane.xlu0 %1404 }
 0xaec   :  { %4432 = vrcp.f32 %v1405_v47  ;;  %v157_v47 = vld [vmem:[%s5204_s6 + $0x28] sm:$0xff] }
 0xaef   :  { %v1487_v48 = vpop.permute.xlu0 %1486 }
 0xaf0   :  { %4092 = vmatpush3.msra.mxu1 %v1487_v48  ;;  %v4333_v48 = vpack.c.bf16 %v157_v47, %v156_v46 }
 0xaf1   :  { %4310 = vmatprep.subr.bf16.mxu1 %v4309_v54 }
 0xaf2   :  { %v4431_v49 = vpop.eup %4430 }
 0xaf3   :  { %v1407_v50 = vmul.f32 %v4431_v49, %v4427_v45  ;;  %v1573_v0 = vpop.permute.xlu0 %1572  ;;  %v154_v45 = vld [vmem:[%s5204_s6 + $0x10] sm:$0xff] }
 0xaf4   :  { %v1589_v3 = vsel %vm1588_vm6, %v1586_v1, %v1573_v0 }
 0xaf5   :  { %4089 = vmatmul.mubr.msk.f32.vlgmr.msra.gmra.mrb[10].mxu0 %vm246_vm4, %v1407_v50 }
 0xaf6   :  { %v4433_v51 = vpop.eup %4432  ;;  %4328 = vmatpush3.bf16.msra.mxu0 %v4325_v38 }
 0xaf7   :  { %v1409_v52 = vmul.f32 %v4433_v51, %v4429_v39  ;;  %v155_v39 = vld [vmem:[%s5204_s6 + $0x18] sm:$0xff] }
 0xaf8   :  { %v4329_v40 = vpack.c.bf16 %v155_v39, %v154_v45  ;;  %v3782_v45 = vld [vmem:[%s5201_s3 + $0x38] sm:$0xff] }
 0xaf9   :  { %4094 = vmatmul.mubr.msk.f32.vlgmr.msra.gmra.mrb[22].mxu1 %vm246_vm4, %v1409_v52  ;;  %v4345_v38 = vpack.c.bf16 %v3782_v45, %v3781_v37 }
 0xafa   :  { %4312 = vmatpush3.bf16.msra.mxu1 %v4309_v54  ;;  %4330 = vmatprep.subr.bf16.mxu0 %v4329_v40  ;;  %v1710_v54 = vsub.s32 1, %v4826_v12 }
 0xafb   :  { %4314 = vmatprep.subr.bf16.mxu1 %v4313_v57  ;;  %4332 = vmatpush3.bf16.msra.mxu0 %v4329_v40 }
 0xafc   :  { %4334 = vmatprep.subr.bf16.mxu0 %v4333_v48  ;;  %v1711_v56 = vrot.slane %v4832_v11, %v1710_v54 }
 0xafe   :  { %4316 = vmatpush3.bf16.msra.mxu1 %v4313_v57 }
 0xaff   :  { %4336 = vmatpush3.bf16.msra.mxu0 %v4333_v48 }
 0xbc8   :  { %v1482_v58 = vpop.f32.mrb[10].mxu0 }
 0xbc9   :  { %1580 = vrot.lane.b32.xlu0 %v1482_v58, %s4523_s1  ;;  %v4090_v59 = vpop.f32.mrb[11].mxu0 }
 0xbca   :  { %v1717_v59 = vrot.slane %v4832_v11, %v1716_v55 }
 0xbcc   :  { %v1558_v60 = vpop.f32.mrb[22].mxu1 }
 0xbcd   :  { %1582 = vrot.lane.b32.xlu1 %v1558_v60, %s4523_s1  ;;  %v4095_v61 = vpop.f32.mrb[23].mxu1 }
 0xc3b   :  { %v1581_v4 = vpop.permute.xlu0 %1580 }
 0xc3c   :  { %v1592_v5 = vsel %vm1591_vm5, %v1589_v3, %v1581_v4  ;;  %v159_v3 = vld [vmem:[%s5204_s6 + $0x38] sm:$0xff] }
 0xc3d   :  { %4104 = vmatprep.mubr.msk.f32.mxu1 %vm161_vm2, %v1592_v5  ;;  %v4337_v4 = vpack.c.bf16 %v159_v3, %v158_v2  ;;  %v1722_v5 = vsub.s32 6, %v4826_v12 }
 0xc3f   :  { %v1583_v8 = vpop.permute.xlu1 %1582  ;;  %4338 = vmatprep.subr.bf16.mxu0 %v4337_v4  ;;  %v1723_v6 = vrot.slane %v4832_v11, %v1722_v5 }
 0xc40   :  { %v1593_v9 = vsel %vm1591_vm5, %v1590_v7, %v1583_v8  ;;  %4340 = vmatpush3.bf16.msra.mxu0 %v4337_v4 }
 0xc41   :  { %4105 = vmatmul.mubr.msk.f32.vlgmr.msra.gmra.mrb[24].mxu1 %vm161_vm2, %v1593_v9  ;;  %4158 = vmatprep.subr.mxu0 %v4508_v43 }
 0xd14   :  { %v4106_v13 = vpop.f32.mrb[24].mxu1 }
 0xd15   :  { %v1676_v15 = vadd.f32 %v4106_v13, %v1597_v14  ;;  %v1670_v16 = vpop.f32.mrb[25].mxu1 }
 0xd16   :  { %v1671_v17 = vadd.f32 %v1670_v16, %v1597_v14  ;;  %v1809_v16 = vsub.s32 3, %v4826_v12 }
 0xd17   :  { %v1680_v18 = vadd.f32 %v1676_v15, %v4643_v42 }
 0xd18   :  { %v1679_v30 = vadd.f32 %v1671_v17, %v4641_v41  ;;  %v148_v41 = vld [vmem:[%s5203_s5] sm:$0xff]  ;;  %v1810_v17 = vrot.slane %v4832_v11, %v1809_v16 }
 0xd19   :  { %v1684_v19 = vsel %vm161_vm2, %v1680_v18, 0.0  ;;  %v4317_v32 = vpack.c.bf16 %v149_v31, %v148_v41 }
 0xd1a   :  { %1685 = vadd.xlane.f32.xlu1 %v1684_v19  ;;  %v1681_v20 = vsel %vm161_vm2, %v1679_v30, 0.0 }
 0xd1b   :  { %1682 = vadd.xlane.f32.xlu0 %v1681_v20  ;;  %4318 = vmatprep.subr.bf16.mxu1 %v4317_v32 }
 0xd1c   :  { %4320 = vmatpush3.bf16.msra.mxu1 %v4317_v32 }
 0xd1d   :  { %4322 = vmatprep.subr.bf16.mxu1 %v4321_v35 }
 0xd20   :  { %4324 = vmatpush3.bf16.msra.mxu1 %v4321_v35  ;;  %v3780_v35 = vld [vmem:[%s5201_s3 + $0x28] sm:$0xff] }
 0xd21   :  { %v4341_v36 = vpack.c.bf16 %v3780_v35, %v3779_v34 }
 0xd23   :  { %4342 = vmatprep.subr.bf16.mxu1 %v4341_v36 }
 0xda7   :  { %v1686_v21 = vpop.xlane.xlu1 %1685 }
 0xda8   :  { %v1689_v22 = vmul.f32 0.03125, %v1686_v21  ;;  %v1683_v23 = vpop.xlane.xlu0 %1682 }
 0xda9   :  { %v1688_v24 = vmul.f32 0.03125, %v1683_v23 }
 0xdaa   :  { %v1691_v25 = vsub.f32 %v1680_v18, %v1689_v22 }
 0xdab   :  { %v1690_v26 = vsub.f32 %v1679_v30, %v1688_v24 }
 0xdac   :  { %v1693_v29 = vmul.f32 %v1691_v25, %v1691_v25 }
 0xdad   :  { %v1692_v27 = vmul.f32 %v1690_v26, %v1690_v26 }
 0xdae   :  { %v1697_v42 = vsel %vm161_vm2, %v1693_v29, 0.0 }
 0xdaf   :  { %v1694_v28 = vsel %vm161_vm2, %v1692_v27, 0.0 }
 0xdb0   :  { %1695 = vadd.xlane.f32.xlu0 %v1694_v28 }
 0xdb4   :  { %1698 = vadd.xlane.f32.xlu0 %v1697_v42 }
 0xe3d   :  { %v1696_v49 = vpop.xlane.xlu0 %1695 }
 0xe3e   :  { %v1700_v50 = vmul.f32 0.03125, %v1696_v49 }
 0xe40   :  { %v1702_v51 = vadd.f32 1e-05, %v1700_v50  ;;  %v1923_v50 = vsub.s32 4, %v4826_v12 }
 0xe41   :  { %v1699_v52 = vpop.xlane.xlu0 %1698 }
 0xe42   :  { %4434 = vrsqrt.f32 %v1702_v51  ;;  %v1701_v44 = vmul.f32 0.03125, %v1699_v52  ;;  %v1929_v51 = vsub.s32 5, %v4826_v12  ;;  %v1924_v52 = vrot.slane %v4832_v11, %v1923_v50 }
 0xe44   :  { %v1703_v53 = vadd.f32 1e-05, %v1701_v44 }
 0xe46   :  { %4436 = vrsqrt.f32 %v1703_v53 }
 0xe4c   :  { %v4435_v57 = vpop.eup %4434 }
 0xe4d   :  { %v1706_v58 = vmul.f32 %v4435_v57, %v1690_v26 }
 0xe4f   :  { %v1712_v60 = vmul.f32 %v1711_v56, %v1706_v58  ;;  %v1930_v58 = vrot.slane %v4832_v11, %v1929_v51 }
 0xe50   :  { %v4437_v61 = vpop.eup %4436 }
 0xe51   :  { %v1707_v62 = vmul.f32 %v4437_v61, %v1691_v25  ;;  %v1718_v63 = vadd.f32 %v1717_v59, %v1712_v60 }
 0xe53   :  { %v1713_v0 = vmul.f32 %v1711_v56, %v1707_v62  ;;  %4115 = vmatprep.mubr.msk.f32.mxu1 %vm161_vm2, %v1718_v63 }
 0xe55   :  { %v1719_v1 = vadd.f32 %v1717_v59, %v1713_v0 }
 0xe57   :  { %4116 = vmatmul.mubr.msk.f32.vlgmr.msra.gmra.mrb[26].mxu1 %vm161_vm2, %v1719_v1 }
 0xe58   :  { %4344 = vmatpush3.bf16.msra.mxu1 %v4341_v36 }
 0xe59   :  { %4346 = vmatprep.subr.bf16.mxu1 %v4345_v38 }
 0xe5c   :  { %4348 = vmatpush3.bf16.msra.mxu1 %v4345_v38 }
 0xe5d   :  { %4148 = vmatprep.subr.mxu1 %v4508_v43 }
 0xf2a   :  { %v4117_v7 = vpop.f32.mrb[26].mxu1 }
 0xf2b   :  { %v1802_v8 = vadd.f32 %v4117_v7, %v1723_v6  ;;  %v1796_v9 = vpop.f32.mrb[27].mxu1 }
 0xf2c   :  { %v1797_v14 = vadd.f32 %v1796_v9, %v1723_v6 }
 0xf2d   :  { %v1806_v15 = vmax.f32 %v1802_v8, 0.0 }
 0xf2e   :  { %v1805_v13 = vmax.f32 %v1797_v14, 0.0 }
 0xf30   :  { %4134 = vmatprep.mubr.msk.f32.mxu0 %vm1811_vm7, %v1805_v13 }
 0xf31   :  { %4135 = vmatmul.mubr.msk.f32.vlgmr.msra.gmra.mrb[12].mxu0 %vm1811_vm7, %v1806_v15 }
 0xf32   :  { %4160 = vmatprep.mubr.msk.f32.mxu0 %vm4509_vm3, %v4508_v43 }
0x1004   :  { %v4136_v18 = vpop.f32.mrb[12].mxu0 }
0x1005   :  { %v1890_v30 = vadd.f32 %v4136_v18, %v1810_v17  ;;  %v1884_v19 = vpop.f32.mrb[13].mxu0 }
0x1006   :  { %v1885_v20 = vadd.f32 %v1884_v19, %v1810_v17 }
0x1007   :  { %v1894_v21 = vadd.f32 %v1890_v30, %v1719_v1 }
0x1008   :  { %v1893_v22 = vadd.f32 %v1885_v20, %v1718_v63 }
0x1009   :  { %v1898_v23 = vsel %vm161_vm2, %v1894_v21, 0.0 }
0x100a   :  { %1899 = vadd.xlane.f32.xlu0 %v1898_v23  ;;  %v1895_v24 = vsel %vm161_vm2, %v1893_v22, 0.0 }
0x100b   :  { %1896 = vadd.xlane.f32.xlu1 %v1895_v24 }
0x1097   :  { %v1900_v25 = vpop.xlane.xlu0 %1899 }
0x1098   :  { %v1902_v26 = vmul.f32 0.03125, %v1900_v25  ;;  %v1897_v27 = vpop.xlane.xlu1 %1896 }
0x1099   :  { %v1901_v28 = vmul.f32 0.03125, %v1897_v27 }
0x109a   :  { %v1904_v29 = vsub.f32 %v1894_v21, %v1902_v26 }
0x109b   :  { %v1903_v42 = vsub.f32 %v1893_v22, %v1901_v28 }
0x109c   :  { %v1906_v41 = vmul.f32 %v1904_v29, %v1904_v29 }
0x109d   :  { %v1905_v31 = vmul.f32 %v1903_v42, %v1903_v42 }
0x109e   :  { %v1910_v32 = vsel %vm161_vm2, %v1906_v41, 0.0 }
0x109f   :  { %1911 = vadd.xlane.f32.xlu0 %v1910_v32  ;;  %v1907_v33 = vsel %vm161_vm2, %v1905_v31, 0.0 }
0x10a0   :  { %1908 = vadd.xlane.f32.xlu1 %v1907_v33 }
0x112c   :  { %v1912_v39 = vpop.xlane.xlu0 %1911 }
0x112d   :  { %v1914_v40 = vmul.f32 0.03125, %v1912_v39  ;;  %v1909_v46 = vpop.xlane.xlu1 %1908 }
0x112e   :  { %v1913_v47 = vmul.f32 0.03125, %v1909_v46 }
0x112f   :  { %v1916_v48 = vadd.f32 1e-05, %v1914_v40 }
0x1130   :  { %v1915_v49 = vadd.f32 1e-05, %v1913_v47 }
0x1131   :  { %4438 = vrsqrt.f32 %v1916_v48 }
0x1132   :  { %4440 = vrsqrt.f32 %v1915_v49 }
0x113b   :  { %v4439_v44 = vpop.eup %4438 }
0x113c   :  { %v4441_v53 = vpop.eup %4440  ;;  %v1920_v56 = vmul.f32 %v4439_v44, %v1904_v29 }
0x113d   :  { %v1919_v57 = vmul.f32 %v4441_v53, %v1903_v42 }
0x113e   :  { %v1926_v59 = vmul.f32 %v1924_v52, %v1920_v56 }
0x113f   :  { %v1925_v60 = vmul.f32 %v1924_v52, %v1919_v57 }
0x1140   :  { %v4929_v62 = vadd.f32 %v1930_v58, %v1926_v59 }
0x1141   :  { %v4927_v61 = vadd.f32 %v1930_v58, %v1925_v60 }
0x1143   :  { %4145 = vmatprep.mubr.msk.f32.mxu1 %vm161_vm2, %v4927_v61 }
0x1144   :  { %4146 = vmatmul.mubr.msk.f32.vlgmr.msra.gmra.mrb[28].mxu1 %vm161_vm2, %v4929_v62 }
0x1145   :  { %4150 = vmatprep.mubr.msk.f32.mxu1 %vm4509_vm3, %v4508_v43 }
0x1217   :  { %v4937_v63 = vpop.f32.mrb[28].mxu1 }
0x1218   :  { %2118 = vrot.lane.b32.xlu0 %v4937_v63, %s4510_s2  ;;  %v4941_v11 = vpop.f32.mrb[29].mxu1 }
0x1219   :  { %2041 = vrot.lane.b32.xlu1 %v4941_v11, %s4510_s2 }
0x128a   :  { %v2119_v1 = vpop.permute.xlu0 %2118 }
0x128b   :  { %v2042_v0 = vpop.permute.xlu1 %2041 }
0x128c   :  { %4149 = vmatpush3.xpose.msk.msra.mxu1 %vm246_vm4, %v2042_v0 }
0x128d   :  { %4153 = vmatprep.subr.mxu1 %v4508_v43 }
0x128f   :  { %4151 = vmatmul.mubr.msk.f32.vlgmr.msra.gmra.mrb[30].mxu1 %vm246_vm4, %v4941_v11 }
0x1290   :  { %4154 = vmatpush3.xpose.msk.msra.mxu1 %vm246_vm4, %v2119_v1  ;;  %4155 = vmatprep.mubr.msk.f32.mxu1 %vm4509_vm3, %v4508_v43 }
0x1291   :  { %4163 = vmatprep.subr.mxu1 %v4508_v43 }
0x1293   :  { %4156 = vmatmul.mubr.msk.f32.vlgmr.msra.gmra.mrb[32].mxu1 %vm246_vm4, %v4937_v63 }
0x1294   :  { %4165 = vmatprep.mubr.msk.f32.mxu1 %vm4509_vm3, %v4508_v43 }
0x1362   :  { %v2113_v2 = vpop.f32.mrb[30].mxu1 }
0x1363   :  { %v4152_v3 = vpop.f32.mrb[31].mxu1  ;;  %v2194_v4 = vsel %vm246_vm4, %v2113_v2, -inf }
0x1364   :  { %2195 = vmax.xlane.f32.xlu1 %v2194_v4 }
0x1366   :  { %v2190_v6 = vpop.f32.mrb[32].mxu1 }
0x1367   :  { %v4157_v7 = vpop.f32.mrb[33].mxu1  ;;  %v2197_v8 = vsel %vm246_vm4, %v2190_v6, -inf }
0x1368   :  { %2198 = vmax.xlane.f32.xlu0 %v2197_v8 }
0x1375   :  { %2216 = vrot.lane.b32.xlu1 %v4941_v11, %s4511_s26 }
0x1379   :  { %2370 = vrot.lane.b32.xlu1 %v4941_v11, %s4512_s27 }
0x137d   :  { %2448 = vrot.lane.b32.xlu1 %v4937_v63, %s4512_s27 }
0x137e   :  { %2292 = vrot.lane.b32.xlu0 %v4937_v63, %s4511_s26 }
0x13f1   :  { %v2196_v9 = vpop.xlane.xlu1 %2195 }
0x13f2   :  { %v2200_v14 = vsub.f32 %v2113_v2, %v2196_v9 }
0x13f4   :  { %v2202_v13 = vmul.f32 1.442695, %v2200_v14 }
0x13f5   :  { %v2217_v15 = vpop.permute.xlu1 %2216  ;;  %v2199_v17 = vpop.xlane.xlu0 %2198 }
0x13f6   :  { %4442 = vpow2.f32 %v2202_v13  ;;  %v2201_v18 = vsub.f32 %v2190_v6, %v2199_v17  ;;  %4159 = vmatpush3.msra.mxu0 %v2217_v15 }
0x13f7   :  { %4168 = vmatprep.subr.mxu0 %v4508_v43 }
0x13f8   :  { %v2204_v30 = vmul.f32 1.442695, %v2201_v18 }
0x13f9   :  { %v2293_v19 = vpop.permute.xlu0 %2292  ;;  %v2371_v24 = vpop.permute.xlu1 %2370 }
0x13fa   :  { %4444 = vpow2.f32 %v2204_v30  ;;  %4164 = vmatpush3.msra.mxu1 %v2293_v19 }
0x13fb   :  { %4173 = vmatprep.subr.mxu1 %v4508_v43 }
0x13fd   :  { %v2449_v25 = vpop.permute.xlu1 %2448 }
0x1400   :  { %v4443_v20 = vpop.eup %4442 }
0x1401   :  { %v2206_v21 = vsel %vm246_vm4, %v4443_v20, 0.0 }
0x1402   :  { %2207 = vadd.xlane.f32.xlu1 %v2206_v21 }
0x1404   :  { %v4445_v22 = vpop.eup %4444 }
0x1405   :  { %v2209_v23 = vsel %vm246_vm4, %v4445_v22, 0.0 }
0x1406   :  { %2210 = vadd.xlane.f32.xlu0 %v2209_v23 }
0x1413   :  { %2446 = vrot.lane.b32.xlu1 %v4937_v63, %s4513_s28 }
0x141c   :  { %2368 = vrot.lane.b32.xlu0 %v4941_v11, %s4513_s28 }
0x148f   :  { %v2208_v26 = vpop.xlane.xlu1 %2207 }
0x1490   :  { %4446 = vrcp.f32 %v2208_v26 }
0x1493   :  { %v2211_v27 = vpop.xlane.xlu0 %2210  ;;  %v2447_v32 = vpop.permute.xlu1 %2446 }
0x1494   :  { %4448 = vrcp.f32 %v2211_v27 }
0x1497   :  { %v2369_v31 = vpop.permute.xlu0 %2368 }
0x149a   :  { %v4447_v28 = vpop.eup %4446 }
0x149b   :  { %v2213_v29 = vmul.f32 %v4447_v28, %v4443_v20 }
0x149d   :  { %4161 = vmatmul.mubr.msk.f32.vlgmr.msra.gmra.mrb[14].mxu0 %vm246_vm4, %v2213_v29 }
0x149e   :  { %v4449_v42 = vpop.eup %4448  ;;  %4169 = vmatpush3.xpose.msk.msra.mxu0 %vm246_vm4, %v2371_v24  ;;  %4170 = vmatprep.mubr.msk.f32.mxu0 %vm4509_vm3, %v4508_v43 }
0x149f   :  { %v2215_v41 = vmul.f32 %v4449_v42, %v4445_v22  ;;  %4178 = vmatprep.subr.mxu0 %v4508_v43 }
0x14a1   :  { %4166 = vmatmul.mubr.msk.f32.vlgmr.msra.gmra.mrb[34].mxu1 %vm246_vm4, %v2215_v41  ;;  %4171 = vmatmul.mubr.msk.f32.vlgmr.msra.gmra.mrb[16].mxu0 %vm246_vm4, %v2369_v31 }
0x14a2   :  { %4174 = vmatpush3.xpose.msk.msra.mxu1 %vm246_vm4, %v2449_v25  ;;  %4175 = vmatprep.mubr.msk.f32.mxu1 %vm4509_vm3, %v4508_v43 }
0x14a3   :  { %4183 = vmatprep.subr.mxu1 %v4508_v43  ;;  %4180 = vmatprep.mubr.msk.f32.mxu0 %vm4509_vm3, %v4508_v43 }
0x14a5   :  { %4176 = vmatmul.mubr.msk.f32.vlgmr.msra.gmra.mrb[36].mxu1 %vm246_vm4, %v2447_v32 }
0x14a6   :  { %4185 = vmatprep.mubr.msk.f32.mxu1 %vm4509_vm3, %v4508_v43 }
0x1570   :  { %v4991_v33 = vpop.f32.mrb[14].mxu0 }
0x1571   :  { %v4162_v34 = vpop.f32.mrb[15].mxu0 }
0x1574   :  { %v4993_v35 = vpop.f32.mrb[34].mxu1  ;;  %v2442_v36 = vpop.f32.mrb[16].mxu0 }
0x1575   :  { %v4167_v37 = vpop.f32.mrb[35].mxu1  ;;  %v4172_v45 = vpop.f32.mrb[17].mxu0  ;;  %v2524_v38 = vsel %vm246_vm4, %v2442_v36, -inf }
0x1576   :  { %2525 = vmax.xlane.f32.xlu0 %v2524_v38 }
0x1578   :  { %v2520_v39 = vpop.f32.mrb[36].mxu1 }
0x1579   :  { %v4177_v40 = vpop.f32.mrb[37].mxu1  ;;  %v2527_v46 = vsel %vm246_vm4, %v2520_v39, -inf }
0x157a   :  { %2528 = vmax.xlane.f32.xlu1 %v2527_v46 }
0x158b   :  { %2546 = vrot.lane.b32.xlu1 %v4941_v11, %s4514_s29 }
0x158c   :  { %2622 = vrot.lane.b32.xlu0 %v4937_v63, %s4514_s29 }
0x158f   :  { %2700 = vrot.lane.b32.xlu1 %v4941_v11, %s4515_s30 }
0x1593   :  { %2778 = vrot.lane.b32.xlu1 %v4937_v63, %s4515_s30 }
0x1597   :  { %2776 = vrot.lane.b32.xlu1 %v4937_v63, %s4516_s9 }
0x1603   :  { %v2526_v47 = vpop.xlane.xlu0 %2525 }
0x1604   :  { %v2530_v48 = vsub.f32 %v2442_v36, %v2526_v47 }
0x1606   :  { %v2532_v49 = vmul.f32 1.442695, %v2530_v48 }
0x1607   :  { %v2623_v52 = vpop.permute.xlu0 %2622  ;;  %v2529_v44 = vpop.xlane.xlu1 %2528 }
0x1608   :  { %4450 = vpow2.f32 %v2532_v49  ;;  %v2531_v53 = vsub.f32 %v2520_v39, %v2529_v44  ;;  %4184 = vmatpush3.msra.mxu1 %v2623_v52 }
0x1609   :  { %4193 = vmatprep.subr.mxu1 %v4508_v43 }
0x160a   :  { %v2534_v56 = vmul.f32 1.442695, %v2531_v53 }
0x160b   :  { %v2547_v57 = vpop.permute.xlu1 %2546 }
0x160c   :  { %4452 = vpow2.f32 %v2534_v56  ;;  %4179 = vmatpush3.msra.mxu0 %v2547_v57 }
0x160d   :  { %4188 = vmatprep.subr.mxu0 %v4508_v43 }
0x160f   :  { %v2701_v3 = vpop.permute.xlu1 %2700 }
0x1612   :  { %v4451_v58 = vpop.eup %4450 }
0x1613   :  { %v2536_v59 = vsel %vm246_vm4, %v4451_v58, 0.0  ;;  %v2779_v8 = vpop.permute.xlu1 %2778 }
0x1614   :  { %2537 = vadd.xlane.f32.xlu0 %v2536_v59 }
0x1616   :  { %v4453_v60 = vpop.eup %4452 }
0x1617   :  { %v2539_v0 = vsel %vm246_vm4, %v4453_v60, 0.0  ;;  %v2777_v13 = vpop.permute.xlu1 %2776 }
0x1618   :  { %2540 = vadd.xlane.f32.xlu0 %v2539_v0 }
0x162e   :  { %2698 = vrot.lane.b32.xlu0 %v4941_v11, %s4516_s9 }
0x16a1   :  { %v2538_v1 = vpop.xlane.xlu0 %2537 }
0x16a2   :  { %4454 = vrcp.f32 %v2538_v1 }
0x16a5   :  { %v2541_v2 = vpop.xlane.xlu0 %2540 }
0x16a6   :  { %4456 = vrcp.f32 %v2541_v2 }
0x16a9   :  { %v2699_v14 = vpop.permute.xlu0 %2698 }
0x16ac   :  { %v4455_v4 = vpop.eup %4454 }
0x16ad   :  { %v2543_v6 = vmul.f32 %v4455_v4, %v4451_v58 }
0x16af   :  { %4181 = vmatmul.mubr.msk.f32.vlgmr.msra.gmra.mrb[18].mxu0 %vm246_vm4, %v2543_v6 }
0x16b0   :  { %v4457_v7 = vpop.eup %4456  ;;  %4189 = vmatpush3.xpose.msk.msra.mxu0 %vm246_vm4, %v2701_v3  ;;  %4190 = vmatprep.mubr.msk.f32.mxu0 %vm4509_vm3, %v4508_v43 }
0x16b1   :  { %v2545_v9 = vmul.f32 %v4457_v7, %v4453_v60  ;;  %4198 = vmatprep.subr.mxu0 %v4508_v43 }
0x16b3   :  { %4186 = vmatmul.mubr.msk.f32.vlgmr.msra.gmra.mrb[38].mxu1 %vm246_vm4, %v2545_v9  ;;  %4191 = vmatmul.mubr.msk.f32.vlgmr.msra.gmra.mrb[20].mxu0 %vm246_vm4, %v2699_v14 }
0x16b4   :  { %4194 = vmatpush3.xpose.msk.msra.mxu1 %vm246_vm4, %v2779_v8  ;;  %4195 = vmatprep.mubr.msk.f32.mxu1 %vm4509_vm3, %v4508_v43 }
0x16b5   :  { %4203 = vmatprep.subr.mxu1 %v4508_v43  ;;  %4200 = vmatprep.mubr.msk.f32.mxu0 %vm4509_vm3, %v4508_v43 }
0x16b7   :  { %4196 = vmatmul.mubr.msk.f32.vlgmr.msra.gmra.mrb[40].mxu1 %vm246_vm4, %v2777_v13 }
0x16b8   :  { %4205 = vmatprep.mubr.msk.f32.mxu1 %vm4509_vm3, %v4508_v43 }
0x1782   :  { %v5029_v15 = vpop.f32.mrb[18].mxu0 }
0x1783   :  { %v4182_v17 = vpop.f32.mrb[19].mxu0 }
0x1786   :  { %v5031_v18 = vpop.f32.mrb[38].mxu1  ;;  %v2772_v30 = vpop.f32.mrb[20].mxu0 }
0x1787   :  { %v4187_v19 = vpop.f32.mrb[39].mxu1  ;;  %v4192_v20 = vpop.f32.mrb[21].mxu0  ;;  %v2854_v21 = vsel %vm246_vm4, %v2772_v30, -inf }
0x1788   :  { %2855 = vmax.xlane.f32.xlu0 %v2854_v21 }
0x178a   :  { %v2850_v22 = vpop.f32.mrb[40].mxu1 }
0x178b   :  { %v4197_v23 = vpop.f32.mrb[41].mxu1  ;;  %v2857_v24 = vsel %vm246_vm4, %v2850_v22, -inf }
0x178c   :  { %2858 = vmax.xlane.f32.xlu1 %v2857_v24  ;;  %v3784_v24 = vld [vmem:[%s5202_s4 + $0x28] sm:$0xff] }
0x179d   :  { %2876 = vrot.lane.b32.xlu1 %v4941_v11, %s4517_s10 }
0x179e   :  { %2952 = vrot.lane.b32.xlu0 %v4937_v63, %s4517_s10 }
0x17a1   :  { %3030 = vrot.lane.b32.xlu1 %v4941_v11, %s4518_s11 }
0x17a5   :  { %3108 = vrot.lane.b32.xlu1 %v4937_v63, %s4518_s11 }
0x17a9   :  { %3106 = vrot.lane.b32.xlu1 %v4937_v63, %s4519_s12 }
0x1815   :  { %v2856_v25 = vpop.xlane.xlu0 %2855 }
0x1816   :  { %v2860_v26 = vsub.f32 %v2772_v30, %v2856_v25 }
0x1818   :  { %v2862_v27 = vmul.f32 1.442695, %v2860_v26  ;;  %v3785_v26 = vld [vmem:[%s5202_s4 + $0x30] sm:$0xff] }
0x1819   :  { %v2953_v28 = vpop.permute.xlu0 %2952  ;;  %v2859_v29 = vpop.xlane.xlu1 %2858 }
0x181a   :  { %4458 = vpow2.f32 %v2862_v27  ;;  %v2861_v42 = vsub.f32 %v2850_v22, %v2859_v29  ;;  %4204 = vmatpush3.msra.mxu1 %v2953_v28  ;;  %v3786_v27 = vld [vmem:[%s5202_s4 + $0x38] sm:$0xff] }
0x181b   :  { %4213 = vmatprep.subr.mxu1 %v4508_v43  ;;  %v4353_v28 = vpack.c.bf16 %v3786_v27, %v3785_v26 }
0x181c   :  { %v2864_v41 = vmul.f32 1.442695, %v2861_v42 }
0x181d   :  { %v2877_v31 = vpop.permute.xlu1 %2876 }
0x181e   :  { %4460 = vpow2.f32 %v2864_v41  ;;  %4199 = vmatpush3.msra.mxu0 %v2877_v31 }
0x181f   :  { %4208 = vmatprep.subr.mxu0 %v4508_v43 }
0x1821   :  { %v3031_v39 = vpop.permute.xlu1 %3030 }
0x1824   :  { %v4459_v32 = vpop.eup %4458 }
0x1825   :  { %v2866_v34 = vsel %vm246_vm4, %v4459_v32, 0.0  ;;  %v3109_v48 = vpop.permute.xlu1 %3108 }
0x1826   :  { %2867 = vadd.xlane.f32.xlu0 %v2866_v34 }
0x1828   :  { %v4461_v36 = vpop.eup %4460 }
0x1829   :  { %v2869_v37 = vsel %vm246_vm4, %v4461_v36, 0.0  ;;  %v3107_v44 = vpop.permute.xlu1 %3106 }
0x182a   :  { %2870 = vadd.xlane.f32.xlu0 %v2869_v37 }
0x1840   :  { %3028 = vrot.lane.b32.xlu0 %v4941_v11, %s4519_s12 }
0x18b3   :  { %v2868_v45 = vpop.xlane.xlu0 %2867 }
0x18b4   :  { %4462 = vrcp.f32 %v2868_v45 }
0x18b7   :  { %v2871_v38 = vpop.xlane.xlu0 %2870 }
0x18b8   :  { %4464 = vrcp.f32 %v2871_v38 }
0x18bb   :  { %v3029_v52 = vpop.permute.xlu0 %3028 }
0x18be   :  { %v4463_v40 = vpop.eup %4462 }
0x18bf   :  { %v2873_v46 = vmul.f32 %v4463_v40, %v4459_v32 }
0x18c1   :  { %4201 = vmatmul.mubr.msk.f32.vlgmr.msra.gmra.mrb[22].mxu0 %vm246_vm4, %v2873_v46 }
0x18c2   :  { %v4465_v47 = vpop.eup %4464  ;;  %4209 = vmatpush3.xpose.msk.msra.mxu0 %vm246_vm4, %v3031_v39  ;;  %4210 = vmatprep.mubr.msk.f32.mxu0 %vm4509_vm3, %v4508_v43 }
0x18c3   :  { %v2875_v49 = vmul.f32 %v4465_v47, %v4461_v36  ;;  %4218 = vmatprep.subr.mxu0 %v4508_v43 }
0x18c5   :  { %4206 = vmatmul.mubr.msk.f32.vlgmr.msra.gmra.mrb[42].mxu1 %vm246_vm4, %v2875_v49  ;;  %4211 = vmatmul.mubr.msk.f32.vlgmr.msra.gmra.mrb[24].mxu0 %vm246_vm4, %v3029_v52 }
0x18c6   :  { %4214 = vmatpush3.xpose.msk.msra.mxu1 %vm246_vm4, %v3109_v48  ;;  %4215 = vmatprep.mubr.msk.f32.mxu1 %vm4509_vm3, %v4508_v43 }
0x18c7   :  { %4223 = vmatprep.subr.mxu1 %v4508_v43  ;;  %4220 = vmatprep.mubr.msk.f32.mxu0 %vm4509_vm3, %v4508_v43 }
0x18c9   :  { %4216 = vmatmul.mubr.msk.f32.vlgmr.msra.gmra.mrb[44].mxu1 %vm246_vm4, %v3107_v44 }
0x18ca   :  { %4225 = vmatprep.mubr.msk.f32.mxu1 %vm4509_vm3, %v4508_v43 }
0x1994   :  { %v2948_v53 = vpop.f32.mrb[22].mxu0 }
0x1995   :  { %v4202_v56 = vpop.f32.mrb[23].mxu0 }
0x1998   :  { %v3024_v57 = vpop.f32.mrb[42].mxu1  ;;  %v3102_v58 = vpop.f32.mrb[24].mxu0 }
0x1999   :  { %v4207_v59 = vpop.f32.mrb[43].mxu1  ;;  %v4212_v60 = vpop.f32.mrb[25].mxu0  ;;  %v3184_v0 = vsel %vm246_vm4, %v3102_v58, -inf }
0x199a   :  { %3185 = vmax.xlane.f32.xlu0 %v3184_v0 }
0x199c   :  { %v3180_v1 = vpop.f32.mrb[44].mxu1 }
0x199d   :  { %v4217_v2 = vpop.f32.mrb[45].mxu1  ;;  %v3187_v3 = vsel %vm246_vm4, %v3180_v1, -inf }
0x199e   :  { %3188 = vmax.xlane.f32.xlu1 %v3187_v3 }
0x19af   :  { %3206 = vrot.lane.b32.xlu1 %v4941_v11, %s4520_s13 }
0x19b3   :  { %3360 = vrot.lane.b32.xlu1 %v5029_v15, %s4521_s14 }
0x19b7   :  { %3362 = vrot.lane.b32.xlu1 %v5031_v18, %s4521_s14 }
0x19bb   :  { %3370 = vrot.lane.b32.xlu1 %v3024_v57, %s4522_s15 }
0x1a27   :  { %v3186_v43 = vpop.xlane.xlu0 %3185 }
0x1a28   :  { %v3190_v4 = vsub.f32 %v3102_v58, %v3186_v43 }
0x1a2a   :  { %v3192_v6 = vmul.f32 1.442695, %v3190_v4 }
0x1a2b   :  { %v3189_v7 = vpop.xlane.xlu1 %3188 }
0x1a2c   :  { %4466 = vpow2.f32 %v3192_v6  ;;  %v3191_v8 = vsub.f32 %v3180_v1, %v3189_v7 }
0x1a2e   :  { %v3194_v9 = vmul.f32 1.442695, %v3191_v8  ;;  %v3788_v8 = vld [vmem:[%s5203_s5 + $0x28] sm:$0xff] }
0x1a2f   :  { %v3207_v14 = vpop.permute.xlu1 %3206 }
0x1a30   :  { %4468 = vpow2.f32 %v3194_v9  ;;  %4219 = vmatpush3.msra.mxu0 %v3207_v14  ;;  %v3789_v14 = vld [vmem:[%s5203_s5 + $0x30] sm:$0xff] }
0x1a33   :  { %v3361_v32 = vpop.permute.xlu1 %3360 }
0x1a34   :  { %v3382_v37 = vsel %vm246_vm4, %v4991_v33, %v3361_v32  ;;  %v5110_v33 = vld [vmem:[%s5205_s7 + $0x8] sm:$0x7f] }
0x1a35   :  { %v3391_v52 = vrot.slane %v5110_v33, %v1596_v10 }
0x1a36   :  { %v4467_v13 = vpop.eup %4466 }
0x1a37   :  { %v3196_v11 = vsel %vm246_vm4, %v4467_v13, 0.0  ;;  %v3363_v34 = vpop.permute.xlu1 %3362 }
0x1a38   :  { %3197 = vadd.xlane.f32.xlu0 %v3196_v11  ;;  %v3383_v46 = vsel %vm246_vm4, %v4993_v35, %v3363_v34 }
0x1a3a   :  { %v4469_v15 = vpop.eup %4468 }
0x1a3b   :  { %v3199_v17 = vsel %vm246_vm4, %v4469_v15, 0.0  ;;  %v3371_v45 = vpop.permute.xlu1 %3370 }
0x1a3c   :  { %3200 = vadd.xlane.f32.xlu0 %v3199_v17  ;;  %v3385_v47 = vsel %vm1588_vm6, %v3383_v46, %v3371_v45  ;;  %v3792_v17 = vld [vmem:[%s5204_s6 + $0x48] sm:$0xff] }
0x1a52   :  { %3282 = vrot.lane.b32.xlu0 %v4937_v63, %s4520_s13  ;;  %v3783_v63 = vld [vmem:[%s5202_s4 + $0x20] sm:$0xff] }
0x1a53   :  { %v4349_v25 = vpack.c.bf16 %v3784_v24, %v3783_v63 }
0x1a55   :  { %4350 = vmatprep.subr.bf16.mxu0 %v4349_v25 }
0x1a56   :  { %3368 = vrot.lane.b32.xlu0 %v2948_v53, %s4522_s15 }
0x1ac5   :  { %v3198_v18 = vpop.xlane.xlu0 %3197 }
0x1ac6   :  { %4470 = vrcp.f32 %v3198_v18  ;;  %v3793_v18 = vld [vmem:[%s5204_s6 + $0x50] sm:$0xff] }
0x1ac9   :  { %v3201_v30 = vpop.xlane.xlu0 %3200 }
0x1aca   :  { %4472 = vrcp.f32 %v3201_v30 }
0x1acd   :  { %v3283_v19 = vpop.permute.xlu0 %3282 }
0x1ace   :  { %4224 = vmatpush3.msra.mxu1 %v3283_v19  ;;  %v3794_v19 = vld [vmem:[%s5204_s6 + $0x58] sm:$0xff] }
0x1ad0   :  { %v4471_v20 = vpop.eup %4470 }
0x1ad1   :  { %v3203_v21 = vmul.f32 %v4471_v20, %v4467_v13  ;;  %v3369_v36 = vpop.permute.xlu0 %3368  ;;  %v3790_v13 = vld [vmem:[%s5203_s5 + $0x38] sm:$0xff]  ;;  %v4369_v20 = vpack.c.bf16 %v3794_v19, %v3793_v18  ;;  %v3722_v19 = vrot.slane %v5110_v33, %v1929_v51 }
0x1ad2   :  { %v3384_v38 = vsel %vm1588_vm6, %v3382_v37, %v3369_v36  ;;  %v4361_v11 = vpack.c.bf16 %v3790_v13, %v3789_v14 }
0x1ad3   :  { %4221 = vmatmul.mubr.msk.f32.vlgmr.msra.gmra.mrb[26].mxu0 %vm246_vm4, %v3203_v21  ;;  %v3795_v21 = vld [vmem:[%s5204_s6 + $0x60] sm:$0xff] }
0x1ad4   :  { %v4473_v22 = vpop.eup %4472  ;;  %4352 = vmatpush3.bf16.msra.mxu0 %v4349_v25 }
0x1ad5   :  { %v3205_v23 = vmul.f32 %v4473_v22, %v4469_v15  ;;  %4354 = vmatprep.subr.bf16.mxu0 %v4353_v28  ;;  %v3791_v15 = vld [vmem:[%s5204_s6 + $0x40] sm:$0xff]  ;;  %v3796_v22 = vld [vmem:[%s5204_s6 + $0x68] sm:$0xff] }
0x1ad6   :  { %v4365_v30 = vpack.c.bf16 %v3792_v17, %v3791_v15  ;;  %v3716_v15 = vrot.slane %v5110_v33, %v1923_v50 }
0x1ad7   :  { %4226 = vmatmul.mubr.msk.f32.vlgmr.msra.gmra.mrb[46].mxu1 %vm246_vm4, %v3205_v23  ;;  %v4373_v23 = vpack.c.bf16 %v3796_v22, %v3795_v21 }
0x1ad8   :  { %4356 = vmatpush3.bf16.msra.mxu0 %v4353_v28 }
0x1ad9   :  { %4366 = vmatprep.subr.bf16.mxu0 %v4365_v30 }
0x1ba6   :  { %v3278_v29 = vpop.f32.mrb[26].mxu0 }
0x1ba7   :  { %3376 = vrot.lane.b32.xlu0 %v3278_v29, %s4523_s1  ;;  %v4222_v42 = vpop.f32.mrb[27].mxu0  ;;  %v3504_v29 = vrot.slane %v5110_v33, %v1710_v54  ;;  %v3797_v54 = vld [vmem:[%s5204_s6 + $0x70] sm:$0xff] }
0x1baa   :  { %v3354_v41 = vpop.f32.mrb[46].mxu1 }
0x1bab   :  { %3378 = vrot.lane.b32.xlu1 %v3354_v41, %s4523_s1  ;;  %v4227_v31 = vpop.f32.mrb[47].mxu1 }
0x1bac   :  { %v3510_v31 = vrot.slane %v5110_v33, %v1716_v55  ;;  %v3516_v55 = vrot.slane %v5110_v33, %v1722_v5 }
0x1c19   :  { %v3377_v39 = vpop.permute.xlu0 %3376 }
0x1c1a   :  { %v3386_v40 = vsel %vm1591_vm5, %v3384_v38, %v3377_v39  ;;  %v3798_v39 = vld [vmem:[%s5204_s6 + $0x78] sm:$0xff]  ;;  %s4524_s6 = smov [#allocation2]  }
0x1c1b   :  { %4236 = vmatprep.mubr.msk.f32.mxu0 %vm161_vm2, %v3386_v40  ;;  %v4377_v40 = vpack.c.bf16 %v3798_v39, %v3797_v54  ;;  %s3732_s30 = sshll.u32 %s4524_s6, 4  ;;  %s3733_s30 = int_to_ptr.vmem [resolvable:$true] %s3732_s30 }
0x1c1c   :  { %s4482_s9 = scalar_lea.vmem %s3733_s30, 256  ;;  %p4487_p1 = scmp.lt.s32.totalorder %s3733_s30, %s3733_s30 }
0x1c1d   :  { %v3379_v48 = vpop.permute.xlu1 %3378  ;;  %p4483_p0 = scmp.ne.s32.totalorder %s3733_s30, %s4482_s9  ;;  %p4488_p2 = scmp.lt.s32.totalorder %s4482_s9, %s4482_s9 }
0x1c1e   :  { %v3387_v49 = vsel %vm1591_vm5, %v3385_v47, %v3379_v48 }
0x1c1f   :  { %4237 = vmatmul.mubr.msk.f32.vlgmr.msra.gmra.mrb[28].mxu0 %vm161_vm2, %v3387_v49  ;;  %p4489_p3 = por %p4488_p2, %p4487_p1 }
0x1c20   :  { %4368 = vmatpush3.bf16.msra.mxu0 %v4365_v30 }
0x1c21   :  { %4370 = vmatprep.subr.bf16.mxu0 %v4369_v20  ;;  %p4490_p4 = pnand %p4489_p3, %p4483_p0 }
0x1c24   :  { %4372 = vmatpush3.bf16.msra.mxu0 %v4369_v20 }
0x1c25   :  { %4374 = vmatprep.subr.bf16.mxu0 %v4373_v23 }
0x1c28   :  { %4376 = vmatpush3.bf16.msra.mxu0 %v4373_v23 }
0x1c29   :  { %4378 = vmatprep.subr.bf16.mxu0 %v4377_v40 }
0x1c2c   :  { %4380 = vmatpush3.bf16.msra.mxu0 %v4377_v40 }
0x1cf2   :  { %v4238_v44 = vpop.f32.mrb[28].mxu0 }
0x1cf3   :  { %v3470_v53 = vadd.f32 %v4238_v44, %v3391_v52  ;;  %v3464_v56 = vpop.f32.mrb[29].mxu0 }
0x1cf4   :  { %v3465_v35 = vadd.f32 %v3464_v56, %v3391_v52 }
0x1cf5   :  { %v3474_v57 = vadd.f32 %v3470_v53, %v4929_v62  ;;  %v3603_v53 = vrot.slane %v5110_v33, %v1809_v16 }
0x1cf6   :  { %v3473_v58 = vadd.f32 %v3465_v35, %v4927_v61  ;;  %v3787_v61 = vld [vmem:[%s5203_s5 + $0x20] sm:$0xff] }
0x1cf7   :  { %v3478_v59 = vsel %vm161_vm2, %v3474_v57, 0.0  ;;  %v4357_v9 = vpack.c.bf16 %v3788_v8, %v3787_v61 }
0x1cf8   :  { %3479 = vadd.xlane.f32.xlu1 %v3478_v59  ;;  %v3475_v60 = vsel %vm161_vm2, %v3473_v58, 0.0 }
0x1cf9   :  { %3476 = vadd.xlane.f32.xlu0 %v3475_v60  ;;  %4358 = vmatprep.subr.bf16.mxu1 %v4357_v9 }
0x1cfa   :  { %4360 = vmatpush3.bf16.msra.mxu1 %v4357_v9 }
0x1cfb   :  { %4362 = vmatprep.subr.bf16.mxu1 %v4361_v11 }
0x1cfe   :  { %4364 = vmatpush3.bf16.msra.mxu1 %v4361_v11 }
0x1d85   :  { %v3480_v0 = vpop.xlane.xlu1 %3479 }
0x1d86   :  { %v3482_v1 = vmul.f32 0.03125, %v3480_v0  ;;  %v3477_v2 = vpop.xlane.xlu0 %3476 }
0x1d87   :  { %v3481_v3 = vmul.f32 0.03125, %v3477_v2 }
0x1d88   :  { %v3484_v43 = vsub.f32 %v3474_v57, %v3482_v1 }
0x1d89   :  { %v3483_v10 = vsub.f32 %v3473_v58, %v3481_v3 }
0x1d8a   :  { %v3486_v7 = vmul.f32 %v3484_v43, %v3484_v43 }
0x1d8b   :  { %v3485_v4 = vmul.f32 %v3483_v10, %v3483_v10 }
0x1d8c   :  { %v3490_v62 = vsel %vm161_vm2, %v3486_v7, 0.0 }
0x1d8d   :  { %v3487_v6 = vsel %vm161_vm2, %v3485_v4, 0.0 }
0x1d8e   :  { %3488 = vadd.xlane.f32.xlu0 %v3487_v6 }
0x1d92   :  { %3491 = vadd.xlane.f32.xlu0 %v3490_v62 }
0x1e1b   :  { %v3489_v63 = vpop.xlane.xlu0 %3488 }
0x1e1c   :  { %v3493_v24 = vmul.f32 0.03125, %v3489_v63 }
0x1e1e   :  { %v3495_v25 = vadd.f32 1e-05, %v3493_v24 }
0x1e1f   :  { %v3492_v26 = vpop.xlane.xlu0 %3491 }
0x1e20   :  { %4474 = vrsqrt.f32 %v3495_v25  ;;  %v3494_v27 = vmul.f32 0.03125, %v3492_v26 }
0x1e22   :  { %v3496_v28 = vadd.f32 1e-05, %v3494_v27 }
0x1e24   :  { %4476 = vrsqrt.f32 %v3496_v28 }
0x1e2a   :  { %v4475_v42 = vpop.eup %4474 }
0x1e2b   :  { %v3499_v41 = vmul.f32 %v4475_v42, %v3483_v10 }
0x1e2d   :  { %v3505_v32 = vmul.f32 %v3504_v29, %v3499_v41 }
0x1e2e   :  { %v4477_v34 = vpop.eup %4476 }
0x1e2f   :  { %v3500_v36 = vmul.f32 %v4477_v34, %v3484_v43  ;;  %v3511_v37 = vadd.f32 %v3510_v31, %v3505_v32 }
0x1e31   :  { %v3506_v45 = vmul.f32 %v3504_v29, %v3500_v36  ;;  %4247 = vmatprep.mubr.msk.f32.mxu1 %vm161_vm2, %v3511_v37 }
0x1e33   :  { %v3512_v38 = vadd.f32 %v3510_v31, %v3506_v45 }
0x1e35   :  { %4248 = vmatmul.mubr.msk.f32.vlgmr.msra.gmra.mrb[48].mxu1 %vm161_vm2, %v3512_v38 }
0x1f08   :  { %v4249_v46 = vpop.f32.mrb[48].mxu1 }
0x1f09   :  { %v3595_v47 = vadd.f32 %v4249_v46, %v3516_v55  ;;  %v3589_v48 = vpop.f32.mrb[49].mxu1 }
0x1f0a   :  { %v3590_v49 = vadd.f32 %v3589_v48, %v3516_v55 }
0x1f0b   :  { %v3599_v44 = vmax.f32 %v3595_v47, 0.0 }
0x1f0c   :  { %v3598_v52 = vmax.f32 %v3590_v49, 0.0 }
0x1f0e   :  { %4266 = vmatprep.mubr.msk.f32.mxu0 %vm1811_vm7, %v3598_v52 }
0x1f0f   :  { %4267 = vmatmul.mubr.msk.f32.vlgmr.msra.gmra.mrb[30].mxu0 %vm1811_vm7, %v3599_v44 }
0x1fe2   :  { %v4268_v56 = vpop.f32.mrb[30].mxu0 }
0x1fe3   :  { %v3682_v35 = vadd.f32 %v4268_v56, %v3603_v53  ;;  %v3676_v57 = vpop.f32.mrb[31].mxu0 }
0x1fe4   :  { %v3677_v58 = vadd.f32 %v3676_v57, %v3603_v53 }
0x1fe5   :  { %v3686_v59 = vadd.f32 %v3682_v35, %v3512_v38 }
0x1fe6   :  { %v3685_v5 = vadd.f32 %v3677_v58, %v3511_v37 }
0x1fe7   :  { %v3690_v60 = vsel %vm161_vm2, %v3686_v59, 0.0 }
0x1fe8   :  { %3691 = vadd.xlane.f32.xlu0 %v3690_v60  ;;  %v3687_v0 = vsel %vm161_vm2, %v3685_v5, 0.0 }
0x1fe9   :  { %3688 = vadd.xlane.f32.xlu1 %v3687_v0 }
0x2075   :  { %v3692_v1 = vpop.xlane.xlu0 %3691 }
0x2076   :  { %v3694_v2 = vmul.f32 0.03125, %v3692_v1  ;;  %v3689_v3 = vpop.xlane.xlu1 %3688 }
0x2077   :  { %v3693_v43 = vmul.f32 0.03125, %v3689_v3 }
0x2078   :  { %v3696_v10 = vsub.f32 %v3686_v59, %v3694_v2 }
0x2079   :  { %v3695_v4 = vsub.f32 %v3685_v5, %v3693_v43 }
0x207a   :  { %v3698_v6 = vmul.f32 %v3696_v10, %v3696_v10 }
0x207b   :  { %v3697_v16 = vmul.f32 %v3695_v4, %v3695_v4 }
0x207c   :  { %v3702_v7 = vsel %vm161_vm2, %v3698_v6, 0.0 }
0x207d   :  { %3703 = vadd.xlane.f32.xlu0 %v3702_v7  ;;  %v3699_v62 = vsel %vm161_vm2, %v3697_v16, 0.0 }
0x207e   :  { %3700 = vadd.xlane.f32.xlu1 %v3699_v62 }
0x210a   :  { %v3704_v61 = vpop.xlane.xlu0 %3703 }
0x210b   :  { %v3706_v8 = vmul.f32 0.03125, %v3704_v61  ;;  %v3701_v9 = vpop.xlane.xlu1 %3700 }
0x210c   :  { %v3705_v14 = vmul.f32 0.03125, %v3701_v9 }
0x210d   :  { %v3708_v13 = vadd.f32 1e-05, %v3706_v8 }
0x210e   :  { %v3707_v11 = vadd.f32 1e-05, %v3705_v14 }
0x210f   :  { %4478 = vrsqrt.f32 %v3708_v13 }
0x2110   :  { %4480 = vrsqrt.f32 %v3707_v11 }
0x2119   :  { %v4479_v17 = vpop.eup %4478 }
0x211a   :  { %v4481_v18 = vpop.eup %4480  ;;  %v3712_v30 = vmul.f32 %v4479_v17, %v3696_v10 }
0x211b   :  { %v3711_v20 = vmul.f32 %v4481_v18, %v3695_v4 }
0x211c   :  { %v3718_v21 = vmul.f32 %v3716_v15, %v3712_v30 }
0x211d   :  { %v3717_v22 = vmul.f32 %v3716_v15, %v3711_v20 }
0x211e   :  { %v3724_v23 = vadd.f32 %v3722_v19, %v3718_v21 }
0x211f   :  { %v3723_v63 = vadd.f32 %v3722_v19, %v3717_v22 }
0x2120   :  { %3726 = vst.msk [vmem:[#allocation2 + $0x8] sm:$0xff] %vm161_vm2, %v3724_v23 }
0x2121   :  { %3725 = vst.msk [vmem:[#allocation2] sm:$0xff] %vm161_vm2, %v3723_v63 }
0x2122   :  { %4493 = shalt.err (!%p4490_p4)
}
0x2123   :  { %s4494_s7 = scalar_lea.hbm %s5206_s8, 256 }
0x2124   :  { %p4495_p5 = scmp.ne.s32.totalorder %s5206_s8, %s4494_s7  ;;  %p4498_p6 = scmp.lt.u32.totalorder %s4494_s7, %s5206_s8 }
0x2126   :  { %p4500_p7 = pnand %p4498_p6, %p4495_p5 }
0x2128   :  { %4503 = shalt.err (!%p4500_p7)
}
0x2129   :  { %s4525_s1 = smov 128  }
0x212a   :  { %3738 = dma.vmem_to_hbm [thread:$0]  %s3733_s30, 256, %s5206_s8, [#allocation3], %s4525_s1, %s4525_s1, %s4521_s14  }
0x212b   :  { %4504 = dma.done.wait [#allocation3], 256  }
0x212c   :  { %4505 = vsyncadd [#allocation3], 4294967040 }
0x212d   :  { %3742 = vsyncpa [#allocation3], 1 }

</bundles_post_ra>
